<compile_context>
chip_gen: v5e
topology: v5e:2x2
jax: 0.10.0
libtpu: 0.0.40
codegen_flags: <defaults>
</compile_context>

<pallas_src>
import functools
import math

import jax
import jax.numpy as jnp
from jax import lax
from jax.experimental import pallas as pl
from jax.experimental.pallas import tpu as pltpu


def _round_up(x, m):
    return ((x + m - 1) // m) * m


def _sublane(dtype):
    return max(8, 32 // jnp.dtype(dtype).itemsize)


def _layer_norm(h, gamma, beta, d_valid, feat_mask, eps=1e-5):
    """LayerNorm over the last dim, counting only the first d_valid lanes."""
    mean = jnp.sum(h, axis=-1, keepdims=True) * (1.0 / d_valid)
    c = h - mean
    c_m = jnp.where(feat_mask, c, 0.0) if feat_mask is not None else c
    var = jnp.sum(c_m * c_m, axis=-1, keepdims=True) * (1.0 / d_valid)
    return c * lax.rsqrt(var + eps) * gamma + beta


def _tsa_kernel(
    x_ref,                                   # (Bblk, T_pad, D_pad)
    wq_ref, bq_ref, wk_ref, bk_ref, wv_ref, bv_ref,
    w1_ref, b1_ref, w2_ref, b2_ref,
    g1_ref, be1_ref, g2_ref, be2_ref,
    o_ref,                                   # (Bblk, T_pad, D_pad)
    *, t_valid, d_valid,
):
    bblk, T, D = x_ref.shape
    cdt = x_ref.dtype                        # MXU operand dtype
    inv_scale = 1.0 / math.sqrt(d_valid)     # scale uses the true feature dim

    feat_mask = None
    if D != d_valid:
        feat_mask = lax.broadcasted_iota(jnp.int32, (1, D), 1) < d_valid

    # Free leading-dim merge (T_pad is sublane aligned, D_pad is lane aligned).
    xf = x_ref[...].reshape(bblk * T, D)
    xf32 = xf.astype(jnp.float32)

    # ---- Q / K projections (operand-dtype matmuls, fp32 accumulation) ----
    q = jnp.dot(xf, wq_ref[...], preferred_element_type=jnp.float32)
    q = (q + bq_ref[...].astype(jnp.float32)) * inv_scale   # fold 1/sqrt(D)
    k = jnp.dot(xf, wk_ref[...], preferred_element_type=jnp.float32)
    k = k + bk_ref[...].astype(jnp.float32)

    q3 = q.reshape(bblk, T, D).astype(cdt)
    k3 = k.reshape(bblk, T, D).astype(cdt)

    # ---- attention over the temporal axis (feature axis contracted directly,
    #      no k transpose on the critical path) ----
    scores = jnp.einsum("btd,bsd->bts", q3, k3,
                        preferred_element_type=jnp.float32)
    if T != t_valid:
        key_mask = lax.broadcasted_iota(jnp.int32, (1, 1, T), 2) < t_valid
        scores = jnp.where(key_mask, scores, -1e30)
    scores = scores - jnp.max(scores, axis=-1, keepdims=True)
    e = jnp.exp(scores)                                      # EUP
    inv_den = pl.reciprocal(jnp.sum(e, axis=-1, keepdims=True), approx=False)
    attn = e * inv_den                                       # VPU broadcast mul

    # ---- V projection deferred until after softmax (smaller live set) ----
    v = jnp.dot(xf, wv_ref[...], preferred_element_type=jnp.float32)
    v = v + bv_ref[...].astype(jnp.float32)
    v3 = v.reshape(bblk, T, D).astype(cdt)

    context = jnp.einsum("bts,bsd->btd", attn.astype(cdt), v3,
                         preferred_element_type=jnp.float32)

    # ---- residual + LayerNorm1 (fp32 vector math) ----
    h = _layer_norm(context.reshape(bblk * T, D) + xf32,
                    g1_ref[...].astype(jnp.float32),
                    be1_ref[...].astype(jnp.float32),
                    d_valid, feat_mask)

    # ---- FFN: Linear -> ReLU -> Linear ----
    f = jnp.dot(h.astype(cdt), w1_ref[...], preferred_element_type=jnp.float32)
    f = jnp.maximum(f + b1_ref[...].astype(jnp.float32), 0.0)
    f = jnp.dot(f.astype(cdt), w2_ref[...], preferred_element_type=jnp.float32)
    f = f + b2_ref[...].astype(jnp.float32)

    # ---- residual + LayerNorm2 ----
    out = _layer_norm(h + f, g2_ref[...].astype(jnp.float32),
                      be2_ref[...].astype(jnp.float32), d_valid, feat_mask)

    o_ref[...] = out.reshape(bblk, T, D).astype(o_ref.dtype)


def _vmem_estimate(bblk, T, D, x_isz, w_isz, weight_bufs=2):
    m = bblk * T
    stream = 2 * 2 * m * D * x_isz                        # x + out, double-buffered
    weights = weight_bufs * (5 * D * D + 9 * D) * max(w_isz, 4)
    interm = 4 * (7 * m * D + 2 * bblk * T * T)           # fp32 temporaries
    return stream + weights + interm


def _pick_batch_block(B, T, D, x_isz, w_isz, *, target_rows, vmem_budget,
                      max_block=None):
    cap = max(1, target_rows // T)
    cap = min(cap, B)
    if max_block is not None:
        cap = min(cap, max_block)
    best = 1
    for d in range(1, cap + 1):
        if _vmem_estimate(d, T, D, x_isz, w_isz) <= vmem_budget:
            best = d
    # Prefer an exact divisor of B (no padded batches) if it keeps at least
    # half of the achievable block height.
    for d in range(best, 0, -1):
        if B % d == 0:
            return d if 2 * d >= best else best
    return best


def temporal_self_attention(x, params, *, target_rows=None):
    """x: (B, T, D). params: dict of weights (see init_params)."""
    B, T, D = x.shape
    x_isz = jnp.dtype(x.dtype).itemsize
    w_isz = jnp.dtype(params["wq"].dtype).itemsize

    # Lane / sublane alignment (single biggest lever per the perf review).
    D_pad = _round_up(max(D, 128), 128)
    T_pad = _round_up(T, _sublane(x.dtype))

    # Per-generation VMEM limits.
    try:
        vmem_cap = pltpu.get_tpu_info().vmem_capacity_bytes
    except Exception:
        vmem_cap = 64 * 1024 * 1024
    if vmem_cap >= 100 * 1024 * 1024:         # v5e / v6e (128 MiB VMEM, 1 TC)
        vmem_limit = 96 * 1024 * 1024
        vmem_budget = 48 * 1024 * 1024
        rows = 512 if target_rows is None else target_rows
        max_block = None
    else:                                      # v7x-like (64 MiB VMEM, 2 TCs)
        vmem_limit = 40 * 1024 * 1024
        vmem_budget = 16 * 1024 * 1024
        rows = 256 if target_rows is None else target_rows
        max_block = -(-B // 2) if B >= 2 else None   # keep grid >= 2

    bblk = _pick_batch_block(B, T_pad, D_pad, x_isz, w_isz,
                             target_rows=rows, vmem_budget=vmem_budget,
                             max_block=max_block)
    B_pad = _round_up(B, bblk)
    grid = (B_pad // bblk,)

    # Zero-pad activations and parameters to the aligned shapes.  Zero pads are
    # semantics-preserving: padded feature lanes / batches / key positions
    # contribute nothing (gamma/beta pads are zero, padded keys are masked).
    xp = x
    if (B_pad, T_pad, D_pad) != (B, T, D):
        xp = jnp.pad(x, ((0, B_pad - B), (0, T_pad - T), (0, D_pad - D)))

    def pad_w(w):
        return w if D_pad == D else jnp.pad(
            w, ((0, D_pad - w.shape[0]), (0, D_pad - w.shape[1])))

    def pad_v(v):
        return v if D_pad == D else jnp.pad(v, ((0, 0), (0, D_pad - v.shape[1])))

    args = (
        xp,
        pad_w(params["wq"]), pad_v(params["bq"]),
        pad_w(params["wk"]), pad_v(params["bk"]),
        pad_w(params["wv"]), pad_v(params["bv"]),
        pad_w(params["w1"]), pad_v(params["b1"]),
        pad_w(params["w2"]), pad_v(params["b2"]),
        pad_v(params["g1"]), pad_v(params["be1"]),
        pad_v(params["g2"]), pad_v(params["be2"]),
    )

    kernel = functools.partial(_tsa_kernel, t_valid=T, d_valid=D)

    def build(single_buffer_weights):
        buffered = getattr(pl, "Buffered", None)
        w_kwargs = {}
        if single_buffer_weights and buffered is not None:
            # Constant blocks (index map always (0,0)): no need for 2 buffers.
            w_kwargs = dict(pipeline_mode=buffered(1))
        w_spec = pl.BlockSpec((D_pad, D_pad), lambda i: (0, 0), **w_kwargs)
        vec_spec = pl.BlockSpec((1, D_pad), lambda i: (0, 0), **w_kwargs)
        x_spec = pl.BlockSpec((bblk, T_pad, D_pad), lambda i: (i, 0, 0))
        in_specs = [x_spec] + [w_spec, vec_spec] * 5 + [vec_spec] * 4
        return pl.pallas_call(
            kernel,
            out_shape=jax.ShapeDtypeStruct((B_pad, T_pad, D_pad), x.dtype),
            grid_spec=pltpu.PrefetchScalarGridSpec(
                num_scalar_prefetch=0,
                grid=grid,
                in_specs=in_specs,
                out_specs=x_spec,
            ),
            compiler_params=pltpu.CompilerParams(
                dimension_semantics=("parallel",),
                vmem_limit_bytes=vmem_limit,
            ),
        )

    try:
        out = build(True)(*args)
    except Exception:
        # pipeline_mode=pl.Buffered(1) not supported on this jax version.
        out = build(False)(*args)

    if (B_pad, T_pad, D_pad) != (B, T, D):
        out = out[:B, :T, :D]
    return out


def init_params(key, D):
    """Deterministic synthetic weights. Linear weights are (in, out)."""
    keys = jax.random.split(key, 10)
    scale = 1.0 / math.sqrt(D)

    def lin(kw, kb):
        w = jax.random.uniform(kw, (D, D), jnp.float32, -scale, scale)
        b = jax.random.uniform(kb, (1, D), jnp.float32, -scale, scale)
        return w, b

    wq, bq = lin(keys[0], keys[1])
    wk, bk = lin(keys[2], keys[3])
    wv, bv = lin(keys[4], keys[5])
    w1, b1 = lin(keys[6], keys[7])
    w2, b2 = lin(keys[8], keys[9])
    return dict(
        wq=wq, bq=bq, wk=wk, bk=bk, wv=wv, bv=bv,
        w1=w1, b1=b1, w2=w2, b2=b2,
        g1=jnp.ones((1, D), jnp.float32), be1=jnp.zeros((1, D), jnp.float32),
        g2=jnp.ones((1, D), jnp.float32), be2=jnp.zeros((1, D), jnp.float32),
    )


def reference(x, p):
    """Pure-JAX fp32 reference mirroring the PyTorch forward."""
    D = x.shape[-1]
    hp = jax.lax.Precision.HIGHEST
    q = jnp.matmul(x, p["wq"], precision=hp) + p["bq"]
    k = jnp.matmul(x, p["wk"], precision=hp) + p["bk"]
    v = jnp.matmul(x, p["wv"], precision=hp) + p["bv"]
    scores = jnp.einsum("btd,bsd->bts", q, k, precision=hp) / math.sqrt(D)
    attn = jax.nn.softmax(scores, axis=-1)
    ctx = jnp.einsum("bts,bsd->btd", attn, v, precision=hp)
    h = _layer_norm(ctx + x, p["g1"], p["be1"], D, None)
    f = jnp.maximum(jnp.matmul(h, p["w1"], precision=hp) + p["b1"], 0.0)
    f = jnp.matmul(f, p["w2"], precision=hp) + p["b2"]
    return _layer_norm(h + f, p["g2"], p["be2"], D, None)


if __name__ == "__main__":
    B, T, D = 2, 8, 32
    key = jax.random.PRNGKey(0)
    kx, kp = jax.random.split(key)
    x = jax.random.normal(kx, (B, T, D), jnp.float32)
    params = init_params(kp, D)

    ref = reference(x, params)

    # fp32 path. Tolerance left with margin to cover backend-dependent f32
    # matmul pass counts (in practice the error is far smaller).
    out = temporal_self_attention(x, params)
    out = jax.block_until_ready(out)
    assert out.shape == (B, T, D)
    err = float(jnp.max(jnp.abs(out - ref)))
    assert err < 2e-2, f"fp32 max abs err {err}"

    # bf16 MXU-operand path: bf16 activations/weights, fp32 accumulation;
    # biases / LayerNorm params stay fp32.  Also exercises the padded-T
    # (sublane=16) key-mask path.
    bf16 = jnp.bfloat16
    params_bf = dict(params)
    for name in ("wq", "wk", "wv", "w1", "w2"):
        params_bf[name] = params[name].astype(bf16)
    out_bf = temporal_self_attention(x.astype(bf16), params_bf)
    out_bf = jax.block_until_ready(out_bf)
    out_bf32 = out_bf.astype(jnp.float32)
    assert out_bf32.shape == (B, T, D)
    assert bool(jnp.all(jnp.isfinite(out_bf32)))
    err_bf = float(jnp.max(jnp.abs(out_bf32 - ref)))
    assert err_bf < 0.25, f"bf16 max abs err {err_bf}"

    print("KERNEL_OK")
</pallas_src>

<mosaic_0001>
module attributes {stable_mosaic.version = 11 : i64} {
  func.func @_tsa_kernel(%arg0: i32, %arg1: memref<1x8x128xf32, #tpu.memory_space<vmem>>, %arg2: memref<128x128xf32, #tpu.memory_space<vmem>>, %arg3: memref<1x128xf32, #tpu.memory_space<vmem>>, %arg4: memref<128x128xf32, #tpu.memory_space<vmem>>, %arg5: memref<1x128xf32, #tpu.memory_space<vmem>>, %arg6: memref<128x128xf32, #tpu.memory_space<vmem>>, %arg7: memref<1x128xf32, #tpu.memory_space<vmem>>, %arg8: memref<128x128xf32, #tpu.memory_space<vmem>>, %arg9: memref<1x128xf32, #tpu.memory_space<vmem>>, %arg10: memref<128x128xf32, #tpu.memory_space<vmem>>, %arg11: memref<1x128xf32, #tpu.memory_space<vmem>>, %arg12: memref<1x128xf32, #tpu.memory_space<vmem>>, %arg13: memref<1x128xf32, #tpu.memory_space<vmem>>, %arg14: memref<1x128xf32, #tpu.memory_space<vmem>>, %arg15: memref<1x128xf32, #tpu.memory_space<vmem>>, %arg16: memref<1x8x128xf32, #tpu.memory_space<vmem>>) attributes {dimension_semantics = [#tpu.dimension_semantics<parallel>], iteration_bounds = array<i64: 2>, scalar_prefetch = 0 : i64, scratch_operands = 0 : i64, tpu.core_type = #tpu.core_type<tc>, window_params = [{transform_indices = @transform_0, window_bounds = array<i64: 1, 8, 128>}, {pipeline_mode = #tpu.pipeline_mode<synchronous>, transform_indices = @transform_1, window_bounds = array<i64: 128, 128>}, {pipeline_mode = #tpu.pipeline_mode<synchronous>, transform_indices = @transform_2, window_bounds = array<i64: 1, 128>}, {pipeline_mode = #tpu.pipeline_mode<synchronous>, transform_indices = @transform_3, window_bounds = array<i64: 128, 128>}, {pipeline_mode = #tpu.pipeline_mode<synchronous>, transform_indices = @transform_4, window_bounds = array<i64: 1, 128>}, {pipeline_mode = #tpu.pipeline_mode<synchronous>, transform_indices = @transform_5, window_bounds = array<i64: 128, 128>}, {pipeline_mode = #tpu.pipeline_mode<synchronous>, transform_indices = @transform_6, window_bounds = array<i64: 1, 128>}, {pipeline_mode = #tpu.pipeline_mode<synchronous>, transform_indices = @transform_7, window_bounds = array<i64: 128, 128>}, {pipeline_mode = #tpu.pipeline_mode<synchronous>, transform_indices = @transform_8, window_bounds = array<i64: 1, 128>}, {pipeline_mode = #tpu.pipeline_mode<synchronous>, transform_indices = @transform_9, window_bounds = array<i64: 128, 128>}, {pipeline_mode = #tpu.pipeline_mode<synchronous>, transform_indices = @transform_10, window_bounds = array<i64: 1, 128>}, {pipeline_mode = #tpu.pipeline_mode<synchronous>, transform_indices = @transform_11, window_bounds = array<i64: 1, 128>}, {pipeline_mode = #tpu.pipeline_mode<synchronous>, transform_indices = @transform_12, window_bounds = array<i64: 1, 128>}, {pipeline_mode = #tpu.pipeline_mode<synchronous>, transform_indices = @transform_13, window_bounds = array<i64: 1, 128>}, {pipeline_mode = #tpu.pipeline_mode<synchronous>, transform_indices = @transform_14, window_bounds = array<i64: 1, 128>}, {transform_indices = @transform_15, window_bounds = array<i64: 1, 8, 128>}]} {
    %0 = tpu.iota {dimensions = array<i32: 1>} : vector<1x128xi32>
    %c32_i32 = arith.constant 32 : i32
    %1 = vector.broadcast %c32_i32 : i32 to vector<1x128xi32>
    %2 = arith.cmpi slt, %0, %1 : vector<1x128xi32>
    %c0 = arith.constant 0 : index
    %c0_0 = arith.constant 0 : index
    %c0_1 = arith.constant 0 : index
    %3 = vector.load %arg1[%c0, %c0_0, %c0_1] : memref<1x8x128xf32, #tpu.memory_space<vmem>>, vector<1x8x128xf32>
    %4 = vector.shape_cast %3 : vector<1x8x128xf32> to vector<8x128xf32>
    %c0_2 = arith.constant 0 : index
    %c0_3 = arith.constant 0 : index
    %5 = vector.load %arg2[%c0_2, %c0_3] : memref<128x128xf32, #tpu.memory_space<vmem>>, vector<128x128xf32>
    %cst = arith.constant dense<0.000000e+00> : vector<8x128xf32>
    %6 = tpu.matmul %4, %5, %cst {dimension_numbers = #tpu.dot_dimension_numbers<[1], [0], [0], [1], [0, 0, 1, 1], [], []>} : vector<8x128xf32>, vector<128x128xf32>, vector<8x128xf32> -> vector<8x128xf32>
    %c0_4 = arith.constant 0 : index
    %c0_5 = arith.constant 0 : index
    %7 = vector.load %arg3[%c0_4, %c0_5] : memref<1x128xf32, #tpu.memory_space<vmem>>, vector<1x128xf32>
    %8 = vector.broadcast %7 : vector<1x128xf32> to vector<8x128xf32>
    %9 = arith.addf %6, %8 : vector<8x128xf32>
    %cst_6 = arith.constant 0.176776692 : f32
    %10 = vector.broadcast %cst_6 : f32 to vector<8x128xf32>
    %11 = arith.mulf %9, %10 : vector<8x128xf32>
    %c0_7 = arith.constant 0 : index
    %c0_8 = arith.constant 0 : index
    %12 = vector.load %arg4[%c0_7, %c0_8] : memref<128x128xf32, #tpu.memory_space<vmem>>, vector<128x128xf32>
    %cst_9 = arith.constant dense<0.000000e+00> : vector<8x128xf32>
    %13 = tpu.matmul %4, %12, %cst_9 {dimension_numbers = #tpu.dot_dimension_numbers<[1], [0], [0], [1], [0, 0, 1, 1], [], []>} : vector<8x128xf32>, vector<128x128xf32>, vector<8x128xf32> -> vector<8x128xf32>
    %c0_10 = arith.constant 0 : index
    %c0_11 = arith.constant 0 : index
    %14 = vector.load %arg5[%c0_10, %c0_11] : memref<1x128xf32, #tpu.memory_space<vmem>>, vector<1x128xf32>
    %15 = vector.broadcast %14 : vector<1x128xf32> to vector<8x128xf32>
    %16 = arith.addf %13, %15 : vector<8x128xf32>
    %17 = vector.shape_cast %11 : vector<8x128xf32> to vector<1x8x128xf32>
    %18 = vector.shape_cast %16 : vector<8x128xf32> to vector<1x8x128xf32>
    "tpu.trace_start"() <{level = 10 : i32, message = "btd,bsd->bts"}> : () -> ()
    %cst_12 = arith.constant dense<0.000000e+00> : vector<1x8x8xf32>
    %19 = tpu.matmul %17, %18, %cst_12 {dimension_numbers = #tpu.dot_dimension_numbers<[2], [2], [1], [1], [0, 0, 0, 1, 1, 1], [0], [0]>} : vector<1x8x128xf32>, vector<1x8x128xf32>, vector<1x8x8xf32> -> vector<1x8x8xf32>
    "tpu.trace_stop"() : () -> ()
    %cst_13 = arith.constant dense<0xFF800000> : vector<1x8xf32>
    %20 = vector.multi_reduction <maximumf>, %19, %cst_13 [2] : vector<1x8x8xf32> to vector<1x8xf32>
    %21 = vector.shape_cast %20 : vector<1x8xf32> to vector<1x8x1xf32>
    %22 = vector.broadcast %21 : vector<1x8x1xf32> to vector<1x8x8xf32>
    %23 = arith.subf %19, %22 : vector<1x8x8xf32>
    %24 = math.exp %23 : vector<1x8x8xf32>
    %cst_14 = arith.constant dense<0.000000e+00> : vector<1x8xf32>
    %25 = vector.multi_reduction <add>, %24, %cst_14 [2] : vector<1x8x8xf32> to vector<1x8xf32>
    %26 = vector.shape_cast %25 : vector<1x8xf32> to vector<1x8x1xf32>
    %27 = tpu.reciprocal %26 : vector<1x8x1xf32> -> vector<1x8x1xf32>
    %28 = vector.broadcast %27 : vector<1x8x1xf32> to vector<1x8x8xf32>
    %29 = arith.mulf %24, %28 : vector<1x8x8xf32>
    %c0_15 = arith.constant 0 : index
    %c0_16 = arith.constant 0 : index
    %30 = vector.load %arg6[%c0_15, %c0_16] : memref<128x128xf32, #tpu.memory_space<vmem>>, vector<128x128xf32>
    %cst_17 = arith.constant dense<0.000000e+00> : vector<8x128xf32>
    %31 = tpu.matmul %4, %30, %cst_17 {dimension_numbers = #tpu.dot_dimension_numbers<[1], [0], [0], [1], [0, 0, 1, 1], [], []>} : vector<8x128xf32>, vector<128x128xf32>, vector<8x128xf32> -> vector<8x128xf32>
    %c0_18 = arith.constant 0 : index
    %c0_19 = arith.constant 0 : index
    %32 = vector.load %arg7[%c0_18, %c0_19] : memref<1x128xf32, #tpu.memory_space<vmem>>, vector<1x128xf32>
    %33 = vector.broadcast %32 : vector<1x128xf32> to vector<8x128xf32>
    %34 = arith.addf %31, %33 : vector<8x128xf32>
    %35 = vector.shape_cast %34 : vector<8x128xf32> to vector<1x8x128xf32>
    "tpu.trace_start"() <{level = 10 : i32, message = "bts,bsd->btd"}> : () -> ()
    %cst_20 = arith.constant dense<0.000000e+00> : vector<1x8x128xf32>
    %36 = tpu.matmul %29, %35, %cst_20 {dimension_numbers = #tpu.dot_dimension_numbers<[2], [1], [1], [2], [0, 0, 0, 1, 1, 2], [0], [0]>} : vector<1x8x8xf32>, vector<1x8x128xf32>, vector<1x8x128xf32> -> vector<1x8x128xf32>
    "tpu.trace_stop"() : () -> ()
    %37 = vector.shape_cast %36 : vector<1x8x128xf32> to vector<8x128xf32>
    %38 = arith.addf %37, %4 : vector<8x128xf32>
    %c0_21 = arith.constant 0 : index
    %c0_22 = arith.constant 0 : index
    %39 = vector.load %arg12[%c0_21, %c0_22] : memref<1x128xf32, #tpu.memory_space<vmem>>, vector<1x128xf32>
    %c0_23 = arith.constant 0 : index
    %c0_24 = arith.constant 0 : index
    %40 = vector.load %arg13[%c0_23, %c0_24] : memref<1x128xf32, #tpu.memory_space<vmem>>, vector<1x128xf32>
    %cst_25 = arith.constant dense<0.000000e+00> : vector<8xf32>
    %41 = vector.multi_reduction <add>, %38, %cst_25 [1] : vector<8x128xf32> to vector<8xf32>
    %42 = vector.shape_cast %41 : vector<8xf32> to vector<8x1xf32>
    %cst_26 = arith.constant 3.125000e-02 : f32
    %43 = vector.broadcast %cst_26 : f32 to vector<8x1xf32>
    %44 = arith.mulf %42, %43 : vector<8x1xf32>
    %45 = vector.broadcast %44 : vector<8x1xf32> to vector<8x128xf32>
    %46 = arith.subf %38, %45 : vector<8x128xf32>
    %cst_27 = arith.constant 0.000000e+00 : f32
    %47 = vector.shape_cast %2 : vector<1x128xi1> to vector<1x128xi1>
    %48 = vector.broadcast %47 : vector<1x128xi1> to vector<8x128xi1>
    %49 = vector.broadcast %cst_27 : f32 to vector<8x128xf32>
    %50 = arith.select %48, %46, %49 : vector<8x128xi1>, vector<8x128xf32>
    %51 = arith.mulf %50, %50 : vector<8x128xf32>
    %cst_28 = arith.constant dense<0.000000e+00> : vector<8xf32>
    %52 = vector.multi_reduction <add>, %51, %cst_28 [1] : vector<8x128xf32> to vector<8xf32>
    %53 = vector.shape_cast %52 : vector<8xf32> to vector<8x1xf32>
    %cst_29 = arith.constant 3.125000e-02 : f32
    %54 = vector.broadcast %cst_29 : f32 to vector<8x1xf32>
    %55 = arith.mulf %53, %54 : vector<8x1xf32>
    %cst_30 = arith.constant 9.99999974E-6 : f32
    %56 = vector.broadcast %cst_30 : f32 to vector<8x1xf32>
    %57 = arith.addf %55, %56 : vector<8x1xf32>
    %58 = math.rsqrt %57 : vector<8x1xf32>
    %59 = vector.broadcast %58 : vector<8x1xf32> to vector<8x128xf32>
    %60 = arith.mulf %46, %59 : vector<8x128xf32>
    %61 = vector.broadcast %39 : vector<1x128xf32> to vector<8x128xf32>
    %62 = arith.mulf %60, %61 : vector<8x128xf32>
    %63 = vector.broadcast %40 : vector<1x128xf32> to vector<8x128xf32>
    %64 = arith.addf %62, %63 : vector<8x128xf32>
    %c0_31 = arith.constant 0 : index
    %c0_32 = arith.constant 0 : index
    %65 = vector.load %arg8[%c0_31, %c0_32] : memref<128x128xf32, #tpu.memory_space<vmem>>, vector<128x128xf32>
    %cst_33 = arith.constant dense<0.000000e+00> : vector<8x128xf32>
    %66 = tpu.matmul %64, %65, %cst_33 {dimension_numbers = #tpu.dot_dimension_numbers<[1], [0], [0], [1], [0, 0, 1, 1], [], []>} : vector<8x128xf32>, vector<128x128xf32>, vector<8x128xf32> -> vector<8x128xf32>
    %c0_34 = arith.constant 0 : index
    %c0_35 = arith.constant 0 : index
    %67 = vector.load %arg9[%c0_34, %c0_35] : memref<1x128xf32, #tpu.memory_space<vmem>>, vector<1x128xf32>
    %68 = vector.broadcast %67 : vector<1x128xf32> to vector<8x128xf32>
    %69 = arith.addf %66, %68 : vector<8x128xf32>
    %cst_36 = arith.constant 0.000000e+00 : f32
    %70 = vector.broadcast %cst_36 : f32 to vector<8x128xf32>
    %71 = arith.maximumf %69, %70 : vector<8x128xf32>
    %c0_37 = arith.constant 0 : index
    %c0_38 = arith.constant 0 : index
    %72 = vector.load %arg10[%c0_37, %c0_38] : memref<128x128xf32, #tpu.memory_space<vmem>>, vector<128x128xf32>
    %cst_39 = arith.constant dense<0.000000e+00> : vector<8x128xf32>
    %73 = tpu.matmul %71, %72, %cst_39 {dimension_numbers = #tpu.dot_dimension_numbers<[1], [0], [0], [1], [0, 0, 1, 1], [], []>} : vector<8x128xf32>, vector<128x128xf32>, vector<8x128xf32> -> vector<8x128xf32>
    %c0_40 = arith.constant 0 : index
    %c0_41 = arith.constant 0 : index
    %74 = vector.load %arg11[%c0_40, %c0_41] : memref<1x128xf32, #tpu.memory_space<vmem>>, vector<1x128xf32>
    %75 = vector.broadcast %74 : vector<1x128xf32> to vector<8x128xf32>
    %76 = arith.addf %73, %75 : vector<8x128xf32>
    %77 = arith.addf %64, %76 : vector<8x128xf32>
    %c0_42 = arith.constant 0 : index
    %c0_43 = arith.constant 0 : index
    %78 = vector.load %arg14[%c0_42, %c0_43] : memref<1x128xf32, #tpu.memory_space<vmem>>, vector<1x128xf32>
    %c0_44 = arith.constant 0 : index
    %c0_45 = arith.constant 0 : index
    %79 = vector.load %arg15[%c0_44, %c0_45] : memref<1x128xf32, #tpu.memory_space<vmem>>, vector<1x128xf32>
    %cst_46 = arith.constant dense<0.000000e+00> : vector<8xf32>
    %80 = vector.multi_reduction <add>, %77, %cst_46 [1] : vector<8x128xf32> to vector<8xf32>
    %81 = vector.shape_cast %80 : vector<8xf32> to vector<8x1xf32>
    %cst_47 = arith.constant 3.125000e-02 : f32
    %82 = vector.broadcast %cst_47 : f32 to vector<8x1xf32>
    %83 = arith.mulf %81, %82 : vector<8x1xf32>
    %84 = vector.broadcast %83 : vector<8x1xf32> to vector<8x128xf32>
    %85 = arith.subf %77, %84 : vector<8x128xf32>
    %cst_48 = arith.constant 0.000000e+00 : f32
    %86 = vector.shape_cast %2 : vector<1x128xi1> to vector<1x128xi1>
    %87 = vector.broadcast %86 : vector<1x128xi1> to vector<8x128xi1>
    %88 = vector.broadcast %cst_48 : f32 to vector<8x128xf32>
    %89 = arith.select %87, %85, %88 : vector<8x128xi1>, vector<8x128xf32>
    %90 = arith.mulf %89, %89 : vector<8x128xf32>
    %cst_49 = arith.constant dense<0.000000e+00> : vector<8xf32>
    %91 = vector.multi_reduction <add>, %90, %cst_49 [1] : vector<8x128xf32> to vector<8xf32>
    %92 = vector.shape_cast %91 : vector<8xf32> to vector<8x1xf32>
    %cst_50 = arith.constant 3.125000e-02 : f32
    %93 = vector.broadcast %cst_50 : f32 to vector<8x1xf32>
    %94 = arith.mulf %92, %93 : vector<8x1xf32>
    %cst_51 = arith.constant 9.99999974E-6 : f32
    %95 = vector.broadcast %cst_51 : f32 to vector<8x1xf32>
    %96 = arith.addf %94, %95 : vector<8x1xf32>
    %97 = math.rsqrt %96 : vector<8x1xf32>
    %98 = vector.broadcast %97 : vector<8x1xf32> to vector<8x128xf32>
    %99 = arith.mulf %85, %98 : vector<8x128xf32>
    %100 = vector.broadcast %78 : vector<1x128xf32> to vector<8x128xf32>
    %101 = arith.mulf %99, %100 : vector<8x128xf32>
    %102 = vector.broadcast %79 : vector<1x128xf32> to vector<8x128xf32>
    %103 = arith.addf %101, %102 : vector<8x128xf32>
    %104 = vector.shape_cast %103 : vector<8x128xf32> to vector<1x8x128xf32>
    %c0_52 = arith.constant 0 : index
    %c0_53 = arith.constant 0 : index
    %c0_54 = arith.constant 0 : index
    %105 = vector.load %arg16[%c0_52, %c0_53, %c0_54] : memref<1x8x128xf32, #tpu.memory_space<vmem>>, vector<1x8x128xf32>
    tpu.vector_store %arg16[%c0_52, %c0_53, %c0_54], %104 {strides = array<i32>} : memref<1x8x128xf32, #tpu.memory_space<vmem>>, vector<1x8x128xf32>,
    return
  }
  func.func @transform_0(%arg0: i32) -> (i32, i32, i32) {
    %c0_i32 = arith.constant 0 : i32
    %c0_i32_0 = arith.constant 0 : i32
    %c0_i32_1 = arith.constant 0 : i32
    return %arg0, %c0_i32, %c0_i32_0 : i32, i32, i32
  }
  func.func @transform_1(%arg0: i32) -> (i32, i32) {
    %c0_i32 = arith.constant 0 : i32
    %c0_i32_0 = arith.constant 0 : i32
    %c0_i32_1 = arith.constant 0 : i32
    return %c0_i32, %c0_i32_0 : i32, i32
  }
  func.func @transform_2(%arg0: i32) -> (i32, i32) {
    %c0_i32 = arith.constant 0 : i32
    %c0_i32_0 = arith.constant 0 : i32
    %c0_i32_1 = arith.constant 0 : i32
    return %c0_i32, %c0_i32_0 : i32, i32
  }
  func.func @transform_3(%arg0: i32) -> (i32, i32) {
    %c0_i32 = arith.constant 0 : i32
    %c0_i32_0 = arith.constant 0 : i32
    %c0_i32_1 = arith.constant 0 : i32
    return %c0_i32, %c0_i32_0 : i32, i32
  }
  func.func @transform_4(%arg0: i32) -> (i32, i32) {
    %c0_i32 = arith.constant 0 : i32
    %c0_i32_0 = arith.constant 0 : i32
    %c0_i32_1 = arith.constant 0 : i32
    return %c0_i32, %c0_i32_0 : i32, i32
  }
  func.func @transform_5(%arg0: i32) -> (i32, i32) {
    %c0_i32 = arith.constant 0 : i32
    %c0_i32_0 = arith.constant 0 : i32
    %c0_i32_1 = arith.constant 0 : i32
    return %c0_i32, %c0_i32_0 : i32, i32
  }
  func.func @transform_6(%arg0: i32) -> (i32, i32) {
    %c0_i32 = arith.constant 0 : i32
    %c0_i32_0 = arith.constant 0 : i32
    %c0_i32_1 = arith.constant 0 : i32
    return %c0_i32, %c0_i32_0 : i32, i32
  }
  func.func @transform_7(%arg0: i32) -> (i32, i32) {
    %c0_i32 = arith.constant 0 : i32
    %c0_i32_0 = arith.constant 0 : i32
    %c0_i32_1 = arith.constant 0 : i32
    return %c0_i32, %c0_i32_0 : i32, i32
  }
  func.func @transform_8(%arg0: i32) -> (i32, i32) {
    %c0_i32 = arith.constant 0 : i32
    %c0_i32_0 = arith.constant 0 : i32
    %c0_i32_1 = arith.constant 0 : i32
    return %c0_i32, %c0_i32_0 : i32, i32
  }
  func.func @transform_9(%arg0: i32) -> (i32, i32) {
    %c0_i32 = arith.constant 0 : i32
    %c0_i32_0 = arith.constant 0 : i32
    %c0_i32_1 = arith.constant 0 : i32
    return %c0_i32, %c0_i32_0 : i32, i32
  }
  func.func @transform_10(%arg0: i32) -> (i32, i32) {
    %c0_i32 = arith.constant 0 : i32
    %c0_i32_0 = arith.constant 0 : i32
    %c0_i32_1 = arith.constant 0 : i32
    return %c0_i32, %c0_i32_0 : i32, i32
  }
  func.func @transform_11(%arg0: i32) -> (i32, i32) {
    %c0_i32 = arith.constant 0 : i32
    %c0_i32_0 = arith.constant 0 : i32
    %c0_i32_1 = arith.constant 0 : i32
    return %c0_i32, %c0_i32_0 : i32, i32
  }
  func.func @transform_12(%arg0: i32) -> (i32, i32) {
    %c0_i32 = arith.constant 0 : i32
    %c0_i32_0 = arith.constant 0 : i32
    %c0_i32_1 = arith.constant 0 : i32
    return %c0_i32, %c0_i32_0 : i32, i32
  }
  func.func @transform_13(%arg0: i32) -> (i32, i32) {
    %c0_i32 = arith.constant 0 : i32
    %c0_i32_0 = arith.constant 0 : i32
    %c0_i32_1 = arith.constant 0 : i32
    return %c0_i32, %c0_i32_0 : i32, i32
  }
  func.func @transform_14(%arg0: i32) -> (i32, i32) {
    %c0_i32 = arith.constant 0 : i32
    %c0_i32_0 = arith.constant 0 : i32
    %c0_i32_1 = arith.constant 0 : i32
    return %c0_i32, %c0_i32_0 : i32, i32
  }
  func.func @transform_15(%arg0: i32) -> (i32, i32, i32) {
    %c0_i32 = arith.constant 0 : i32
    %c0_i32_0 = arith.constant 0 : i32
    %c0_i32_1 = arith.constant 0 : i32
    return %arg0, %c0_i32, %c0_i32_0 : i32, i32, i32
  }
}

module attributes {stable_mosaic.version = 11 : i64} {
  func.func @_tsa_kernel(%arg0: i32, %arg1: memref<1x8x128xf32, #tpu.memory_space<vmem>>, %arg2: memref<128x128xf32, #tpu.memory_space<vmem>>, %arg3: memref<1x128xf32, #tpu.memory_space<vmem>>, %arg4: memref<128x128xf32, #tpu.memory_space<vmem>>, %arg5: memref<1x128xf32, #tpu.memory_space<vmem>>, %arg6: memref<128x128xf32, #tpu.memory_space<vmem>>, %arg7: memref<1x128xf32, #tpu.memory_space<vmem>>, %arg8: memref<128x128xf32, #tpu.memory_space<vmem>>, %arg9: memref<1x128xf32, #tpu.memory_space<vmem>>, %arg10: memref<128x128xf32, #tpu.memory_space<vmem>>, %arg11: memref<1x128xf32, #tpu.memory_space<vmem>>, %arg12: memref<1x128xf32, #tpu.memory_space<vmem>>, %arg13: memref<1x128xf32, #tpu.memory_space<vmem>>, %arg14: memref<1x128xf32, #tpu.memory_space<vmem>>, %arg15: memref<1x128xf32, #tpu.memory_space<vmem>>, %arg16: memref<1x8x128xf32, #tpu.memory_space<vmem>>) attributes {dimension_semantics = [#tpu.dimension_semantics<parallel>], iteration_bounds = array<i64: 2>, scalar_prefetch = 0 : i64, scratch_operands = 0 : i64, tpu.core_type = #tpu.core_type<tc>, window_params = [{transform_indices = @transform_0, window_bounds = array<i64: 1, 8, 128>}, {pipeline_mode = #tpu.pipeline_mode<synchronous>, transform_indices = @transform_1, window_bounds = array<i64: 128, 128>}, {pipeline_mode = #tpu.pipeline_mode<synchronous>, transform_indices = @transform_2, window_bounds = array<i64: 1, 128>}, {pipeline_mode = #tpu.pipeline_mode<synchronous>, transform_indices = @transform_3, window_bounds = array<i64: 128, 128>}, {pipeline_mode = #tpu.pipeline_mode<synchronous>, transform_indices = @transform_4, window_bounds = array<i64: 1, 128>}, {pipeline_mode = #tpu.pipeline_mode<synchronous>, transform_indices = @transform_5, window_bounds = array<i64: 128, 128>}, {pipeline_mode = #tpu.pipeline_mode<synchronous>, transform_indices = @transform_6, window_bounds = array<i64: 1, 128>}, {pipeline_mode = #tpu.pipeline_mode<synchronous>, transform_indices = @transform_7, window_bounds = array<i64: 128, 128>}, {pipeline_mode = #tpu.pipeline_mode<synchronous>, transform_indices = @transform_8, window_bounds = array<i64: 1, 128>}, {pipeline_mode = #tpu.pipeline_mode<synchronous>, transform_indices = @transform_9, window_bounds = array<i64: 128, 128>}, {pipeline_mode = #tpu.pipeline_mode<synchronous>, transform_indices = @transform_10, window_bounds = array<i64: 1, 128>}, {pipeline_mode = #tpu.pipeline_mode<synchronous>, transform_indices = @transform_11, window_bounds = array<i64: 1, 128>}, {pipeline_mode = #tpu.pipeline_mode<synchronous>, transform_indices = @transform_12, window_bounds = array<i64: 1, 128>}, {pipeline_mode = #tpu.pipeline_mode<synchronous>, transform_indices = @transform_13, window_bounds = array<i64: 1, 128>}, {pipeline_mode = #tpu.pipeline_mode<synchronous>, transform_indices = @transform_14, window_bounds = array<i64: 1, 128>}, {transform_indices = @transform_15, window_bounds = array<i64: 1, 8, 128>}]} {
    %0 = tpu.iota {dimensions = array<i32: 1>} : vector<1x128xi32>
    %c32_i32 = arith.constant 32 : i32
    %1 = vector.broadcast %c32_i32 : i32 to vector<1x128xi32>
    %2 = arith.cmpi slt, %0, %1 : vector<1x128xi32>
    %c0 = arith.constant 0 : index
    %c0_0 = arith.constant 0 : index
    %c0_1 = arith.constant 0 : index
    %3 = vector.load %arg1[%c0, %c0_0, %c0_1] : memref<1x8x128xf32, #tpu.memory_space<vmem>>, vector<1x8x128xf32>
    %4 = vector.shape_cast %3 : vector<1x8x128xf32> to vector<8x128xf32>
    %c0_2 = arith.constant 0 : index
    %c0_3 = arith.constant 0 : index
    %5 = vector.load %arg2[%c0_2, %c0_3] : memref<128x128xf32, #tpu.memory_space<vmem>>, vector<128x128xf32>
    %cst = arith.constant dense<0.000000e+00> : vector<8x128xf32>
    %6 = tpu.matmul %4, %5, %cst {dimension_numbers = #tpu.dot_dimension_numbers<[1], [0], [0], [1], [0, 0, 1, 1], [], []>} : vector<8x128xf32>, vector<128x128xf32>, vector<8x128xf32> -> vector<8x128xf32>
    %c0_4 = arith.constant 0 : index
    %c0_5 = arith.constant 0 : index
    %7 = vector.load %arg3[%c0_4, %c0_5] : memref<1x128xf32, #tpu.memory_space<vmem>>, vector<1x128xf32>
    %8 = vector.broadcast %7 : vector<1x128xf32> to vector<8x128xf32>
    %9 = arith.addf %6, %8 : vector<8x128xf32>
    %cst_6 = arith.constant 0.176776692 : f32
    %10 = vector.broadcast %cst_6 : f32 to vector<8x128xf32>
    %11 = arith.mulf %9, %10 : vector<8x128xf32>
    %c0_7 = arith.constant 0 : index
    %c0_8 = arith.constant 0 : index
    %12 = vector.load %arg4[%c0_7, %c0_8] : memref<128x128xf32, #tpu.memory_space<vmem>>, vector<128x128xf32>
    %cst_9 = arith.constant dense<0.000000e+00> : vector<8x128xf32>
    %13 = tpu.matmul %4, %12, %cst_9 {dimension_numbers = #tpu.dot_dimension_numbers<[1], [0], [0], [1], [0, 0, 1, 1], [], []>} : vector<8x128xf32>, vector<128x128xf32>, vector<8x128xf32> -> vector<8x128xf32>
    %c0_10 = arith.constant 0 : index
    %c0_11 = arith.constant 0 : index
    %14 = vector.load %arg5[%c0_10, %c0_11] : memref<1x128xf32, #tpu.memory_space<vmem>>, vector<1x128xf32>
    %15 = vector.broadcast %14 : vector<1x128xf32> to vector<8x128xf32>
    %16 = arith.addf %13, %15 : vector<8x128xf32>
    %17 = vector.shape_cast %11 : vector<8x128xf32> to vector<1x8x128xf32>
    %18 = vector.shape_cast %16 : vector<8x128xf32> to vector<1x8x128xf32>
    "tpu.trace_start"() <{level = 10 : i32, message = "btd,bsd->bts"}> : () -> ()
    %cst_12 = arith.constant dense<0.000000e+00> : vector<1x8x8xf32>
    %19 = tpu.matmul %17, %18, %cst_12 {dimension_numbers = #tpu.dot_dimension_numbers<[2], [2], [1], [1], [0, 0, 0, 1, 1, 1], [0], [0]>} : vector<1x8x128xf32>, vector<1x8x128xf32>, vector<1x8x8xf32> -> vector<1x8x8xf32>
    "tpu.trace_stop"() : () -> ()
    %cst_13 = arith.constant dense<0xFF800000> : vector<1x8xf32>
    %20 = vector.multi_reduction <maximumf>, %19, %cst_13 [2] : vector<1x8x8xf32> to vector<1x8xf32>
    %21 = vector.shape_cast %20 : vector<1x8xf32> to vector<1x8x1xf32>
    %22 = vector.broadcast %21 : vector<1x8x1xf32> to vector<1x8x8xf32>
    %23 = arith.subf %19, %22 : vector<1x8x8xf32>
    %24 = math.exp %23 : vector<1x8x8xf32>
    %cst_14 = arith.constant dense<0.000000e+00> : vector<1x8xf32>
    %25 = vector.multi_reduction <add>, %24, %cst_14 [2] : vector<1x8x8xf32> to vector<1x8xf32>
    %26 = vector.shape_cast %25 : vector<1x8xf32> to vector<1x8x1xf32>
    %27 = tpu.reciprocal %26 : vector<1x8x1xf32> -> vector<1x8x1xf32>
    %28 = vector.broadcast %27 : vector<1x8x1xf32> to vector<1x8x8xf32>
    %29 = arith.mulf %24, %28 : vector<1x8x8xf32>
    %c0_15 = arith.constant 0 : index
    %c0_16 = arith.constant 0 : index
    %30 = vector.load %arg6[%c0_15, %c0_16] : memref<128x128xf32, #tpu.memory_space<vmem>>, vector<128x128xf32>
    %cst_17 = arith.constant dense<0.000000e+00> : vector<8x128xf32>
    %31 = tpu.matmul %4, %30, %cst_17 {dimension_numbers = #tpu.dot_dimension_numbers<[1], [0], [0], [1], [0, 0, 1, 1], [], []>} : vector<8x128xf32>, vector<128x128xf32>, vector<8x128xf32> -> vector<8x128xf32>
    %c0_18 = arith.constant 0 : index
    %c0_19 = arith.constant 0 : index
    %32 = vector.load %arg7[%c0_18, %c0_19] : memref<1x128xf32, #tpu.memory_space<vmem>>, vector<1x128xf32>
    %33 = vector.broadcast %32 : vector<1x128xf32> to vector<8x128xf32>
    %34 = arith.addf %31, %33 : vector<8x128xf32>
    %35 = vector.shape_cast %34 : vector<8x128xf32> to vector<1x8x128xf32>
    "tpu.trace_start"() <{level = 10 : i32, message = "bts,bsd->btd"}> : () -> ()
    %cst_20 = arith.constant dense<0.000000e+00> : vector<1x8x128xf32>
    %36 = tpu.matmul %29, %35, %cst_20 {dimension_numbers = #tpu.dot_dimension_numbers<[2], [1], [1], [2], [0, 0, 0, 1, 1, 2], [0], [0]>} : vector<1x8x8xf32>, vector<1x8x128xf32>, vector<1x8x128xf32> -> vector<1x8x128xf32>
    "tpu.trace_stop"() : () -> ()
    %37 = vector.shape_cast %36 : vector<1x8x128xf32> to vector<8x128xf32>
    %38 = arith.addf %37, %4 : vector<8x128xf32>
    %c0_21 = arith.constant 0 : index
    %c0_22 = arith.constant 0 : index
    %39 = vector.load %arg12[%c0_21, %c0_22] : memref<1x128xf32, #tpu.memory_space<vmem>>, vector<1x128xf32>
    %c0_23 = arith.constant 0 : index
    %c0_24 = arith.constant 0 : index
    %40 = vector.load %arg13[%c0_23, %c0_24] : memref<1x128xf32, #tpu.memory_space<vmem>>, vector<1x128xf32>
    %cst_25 = arith.constant dense<0.000000e+00> : vector<8xf32>
    %41 = vector.multi_reduction <add>, %38, %cst_25 [1] : vector<8x128xf32> to vector<8xf32>
    %42 = vector.shape_cast %41 : vector<8xf32> to vector<8x1xf32>
    %cst_26 = arith.constant 3.125000e-02 : f32
    %43 = vector.broadcast %cst_26 : f32 to vector<8x1xf32>
    %44 = arith.mulf %42, %43 : vector<8x1xf32>
    %45 = vector.broadcast %44 : vector<8x1xf32> to vector<8x128xf32>
    %46 = arith.subf %38, %45 : vector<8x128xf32>
    %cst_27 = arith.constant 0.000000e+00 : f32
    %47 = vector.shape_cast %2 : vector<1x128xi1> to vector<1x128xi1>
    %48 = vector.broadcast %47 : vector<1x128xi1> to vector<8x128xi1>
    %49 = vector.broadcast %cst_27 : f32 to vector<8x128xf32>
    %50 = arith.select %48, %46, %49 : vector<8x128xi1>, vector<8x128xf32>
    %51 = arith.mulf %50, %50 : vector<8x128xf32>
    %cst_28 = arith.constant dense<0.000000e+00> : vector<8xf32>
    %52 = vector.multi_reduction <add>, %51, %cst_28 [1] : vector<8x128xf32> to vector<8xf32>
    %53 = vector.shape_cast %52 : vector<8xf32> to vector<8x1xf32>
    %cst_29 = arith.constant 3.125000e-02 : f32
    %54 = vector.broadcast %cst_29 : f32 to vector<8x1xf32>
    %55 = arith.mulf %53, %54 : vector<8x1xf32>
    %cst_30 = arith.constant 9.99999974E-6 : f32
    %56 = vector.broadcast %cst_30 : f32 to vector<8x1xf32>
    %57 = arith.addf %55, %56 : vector<8x1xf32>
    %58 = math.rsqrt %57 : vector<8x1xf32>
    %59 = vector.broadcast %58 : vector<8x1xf32> to vector<8x128xf32>
    %60 = arith.mulf %46, %59 : vector<8x128xf32>
    %61 = vector.broadcast %39 : vector<1x128xf32> to vector<8x128xf32>
    %62 = arith.mulf %60, %61 : vector<8x128xf32>
    %63 = vector.broadcast %40 : vector<1x128xf32> to vector<8x128xf32>
    %64 = arith.addf %62, %63 : vector<8x128xf32>
    %c0_31 = arith.constant 0 : index
    %c0_32 = arith.constant 0 : index
    %65 = vector.load %arg8[%c0_31, %c0_32] : memref<128x128xf32, #tpu.memory_space<vmem>>, vector<128x128xf32>
    %cst_33 = arith.constant dense<0.000000e+00> : vector<8x128xf32>
    %66 = tpu.matmul %64, %65, %cst_33 {dimension_numbers = #tpu.dot_dimension_numbers<[1], [0], [0], [1], [0, 0, 1, 1], [], []>} : vector<8x128xf32>, vector<128x128xf32>, vector<8x128xf32> -> vector<8x128xf32>
    %c0_34 = arith.constant 0 : index
    %c0_35 = arith.constant 0 : index
    %67 = vector.load %arg9[%c0_34, %c0_35] : memref<1x128xf32, #tpu.memory_space<vmem>>, vector<1x128xf32>
    %68 = vector.broadcast %67 : vector<1x128xf32> to vector<8x128xf32>
    %69 = arith.addf %66, %68 : vector<8x128xf32>
    %cst_36 = arith.constant 0.000000e+00 : f32
    %70 = vector.broadcast %cst_36 : f32 to vector<8x128xf32>
    %71 = arith.maximumf %69, %70 : vector<8x128xf32>
    %c0_37 = arith.constant 0 : index
    %c0_38 = arith.constant 0 : index
    %72 = vector.load %arg10[%c0_37, %c0_38] : memref<128x128xf32, #tpu.memory_space<vmem>>, vector<128x128xf32>
    %cst_39 = arith.constant dense<0.000000e+00> : vector<8x128xf32>
    %73 = tpu.matmul %71, %72, %cst_39 {dimension_numbers = #tpu.dot_dimension_numbers<[1], [0], [0], [1], [0, 0, 1, 1], [], []>} : vector<8x128xf32>, vector<128x128xf32>, vector<8x128xf32> -> vector<8x128xf32>
    %c0_40 = arith.constant 0 : index
    %c0_41 = arith.constant 0 : index
    %74 = vector.load %arg11[%c0_40, %c0_41] : memref<1x128xf32, #tpu.memory_space<vmem>>, vector<1x128xf32>
    %75 = vector.broadcast %74 : vector<1x128xf32> to vector<8x128xf32>
    %76 = arith.addf %73, %75 : vector<8x128xf32>
    %77 = arith.addf %64, %76 : vector<8x128xf32>
    %c0_42 = arith.constant 0 : index
    %c0_43 = arith.constant 0 : index
    %78 = vector.load %arg14[%c0_42, %c0_43] : memref<1x128xf32, #tpu.memory_space<vmem>>, vector<1x128xf32>
    %c0_44 = arith.constant 0 : index
    %c0_45 = arith.constant 0 : index
    %79 = vector.load %arg15[%c0_44, %c0_45] : memref<1x128xf32, #tpu.memory_space<vmem>>, vector<1x128xf32>
    %cst_46 = arith.constant dense<0.000000e+00> : vector<8xf32>
    %80 = vector.multi_reduction <add>, %77, %cst_46 [1] : vector<8x128xf32> to vector<8xf32>
    %81 = vector.shape_cast %80 : vector<8xf32> to vector<8x1xf32>
    %cst_47 = arith.constant 3.125000e-02 : f32
    %82 = vector.broadcast %cst_47 : f32 to vector<8x1xf32>
    %83 = arith.mulf %81, %82 : vector<8x1xf32>
    %84 = vector.broadcast %83 : vector<8x1xf32> to vector<8x128xf32>
    %85 = arith.subf %77, %84 : vector<8x128xf32>
    %cst_48 = arith.constant 0.000000e+00 : f32
    %86 = vector.shape_cast %2 : vector<1x128xi1> to vector<1x128xi1>
    %87 = vector.broadcast %86 : vector<1x128xi1> to vector<8x128xi1>
    %88 = vector.broadcast %cst_48 : f32 to vector<8x128xf32>
    %89 = arith.select %87, %85, %88 : vector<8x128xi1>, vector<8x128xf32>
    %90 = arith.mulf %89, %89 : vector<8x128xf32>
    %cst_49 = arith.constant dense<0.000000e+00> : vector<8xf32>
    %91 = vector.multi_reduction <add>, %90, %cst_49 [1] : vector<8x128xf32> to vector<8xf32>
    %92 = vector.shape_cast %91 : vector<8xf32> to vector<8x1xf32>
    %cst_50 = arith.constant 3.125000e-02 : f32
    %93 = vector.broadcast %cst_50 : f32 to vector<8x1xf32>
    %94 = arith.mulf %92, %93 : vector<8x1xf32>
    %cst_51 = arith.constant 9.99999974E-6 : f32
    %95 = vector.broadcast %cst_51 : f32 to vector<8x1xf32>
    %96 = arith.addf %94, %95 : vector<8x1xf32>
    %97 = math.rsqrt %96 : vector<8x1xf32>
    %98 = vector.broadcast %97 : vector<8x1xf32> to vector<8x128xf32>
    %99 = arith.mulf %85, %98 : vector<8x128xf32>
    %100 = vector.broadcast %78 : vector<1x128xf32> to vector<8x128xf32>
    %101 = arith.mulf %99, %100 : vector<8x128xf32>
    %102 = vector.broadcast %79 : vector<1x128xf32> to vector<8x128xf32>
    %103 = arith.addf %101, %102 : vector<8x128xf32>
    %104 = vector.shape_cast %103 : vector<8x128xf32> to vector<1x8x128xf32>
    %c0_52 = arith.constant 0 : index
    %c0_53 = arith.constant 0 : index
    %c0_54 = arith.constant 0 : index
    %105 = vector.load %arg16[%c0_52, %c0_53, %c0_54] : memref<1x8x128xf32, #tpu.memory_space<vmem>>, vector<1x8x128xf32>
    tpu.vector_store %arg16[%c0_52, %c0_53, %c0_54], %104 {strides = array<i32>} : memref<1x8x128xf32, #tpu.memory_space<vmem>>, vector<1x8x128xf32>,
    return
  }
  func.func @transform_0(%arg0: i32) -> (i32, i32, i32) {
    %c0_i32 = arith.constant 0 : i32
    %c0_i32_0 = arith.constant 0 : i32
    %c0_i32_1 = arith.constant 0 : i32
    return %arg0, %c0_i32, %c0_i32_0 : i32, i32, i32
  }
  func.func @transform_1(%arg0: i32) -> (i32, i32) {
    %c0_i32 = arith.constant 0 : i32
    %c0_i32_0 = arith.constant 0 : i32
    %c0_i32_1 = arith.constant 0 : i32
    return %c0_i32, %c0_i32_0 : i32, i32
  }
  func.func @transform_2(%arg0: i32) -> (i32, i32) {
    %c0_i32 = arith.constant 0 : i32
    %c0_i32_0 = arith.constant 0 : i32
    %c0_i32_1 = arith.constant 0 : i32
    return %c0_i32, %c0_i32_0 : i32, i32
  }
  func.func @transform_3(%arg0: i32) -> (i32, i32) {
    %c0_i32 = arith.constant 0 : i32
    %c0_i32_0 = arith.constant 0 : i32
    %c0_i32_1 = arith.constant 0 : i32
    return %c0_i32, %c0_i32_0 : i32, i32
  }
  func.func @transform_4(%arg0: i32) -> (i32, i32) {
    %c0_i32 = arith.constant 0 : i32
    %c0_i32_0 = arith.constant 0 : i32
    %c0_i32_1 = arith.constant 0 : i32
    return %c0_i32, %c0_i32_0 : i32, i32
  }
  func.func @transform_5(%arg0: i32) -> (i32, i32) {
    %c0_i32 = arith.constant 0 : i32
    %c0_i32_0 = arith.constant 0 : i32
    %c0_i32_1 = arith.constant 0 : i32
    return %c0_i32, %c0_i32_0 : i32, i32
  }
  func.func @transform_6(%arg0: i32) -> (i32, i32) {
    %c0_i32 = arith.constant 0 : i32
    %c0_i32_0 = arith.constant 0 : i32
    %c0_i32_1 = arith.constant 0 : i32
    return %c0_i32, %c0_i32_0 : i32, i32
  }
  func.func @transform_7(%arg0: i32) -> (i32, i32) {
    %c0_i32 = arith.constant 0 : i32
    %c0_i32_0 = arith.constant 0 : i32
    %c0_i32_1 = arith.constant 0 : i32
    return %c0_i32, %c0_i32_0 : i32, i32
  }
  func.func @transform_8(%arg0: i32) -> (i32, i32) {
    %c0_i32 = arith.constant 0 : i32
    %c0_i32_0 = arith.constant 0 : i32
    %c0_i32_1 = arith.constant 0 : i32
    return %c0_i32, %c0_i32_0 : i32, i32
  }
  func.func @transform_9(%arg0: i32) -> (i32, i32) {
    %c0_i32 = arith.constant 0 : i32
    %c0_i32_0 = arith.constant 0 : i32
    %c0_i32_1 = arith.constant 0 : i32
    return %c0_i32, %c0_i32_0 : i32, i32
  }
  func.func @transform_10(%arg0: i32) -> (i32, i32) {
    %c0_i32 = arith.constant 0 : i32
    %c0_i32_0 = arith.constant 0 : i32
    %c0_i32_1 = arith.constant 0 : i32
    return %c0_i32, %c0_i32_0 : i32, i32
  }
  func.func @transform_11(%arg0: i32) -> (i32, i32) {
    %c0_i32 = arith.constant 0 : i32
    %c0_i32_0 = arith.constant 0 : i32
    %c0_i32_1 = arith.constant 0 : i32
    return %c0_i32, %c0_i32_0 : i32, i32
  }
  func.func @transform_12(%arg0: i32) -> (i32, i32) {
    %c0_i32 = arith.constant 0 : i32
    %c0_i32_0 = arith.constant 0 : i32
    %c0_i32_1 = arith.constant 0 : i32
    return %c0_i32, %c0_i32_0 : i32, i32
  }
  func.func @transform_13(%arg0: i32) -> (i32, i32) {
    %c0_i32 = arith.constant 0 : i32
    %c0_i32_0 = arith.constant 0 : i32
    %c0_i32_1 = arith.constant 0 : i32
    return %c0_i32, %c0_i32_0 : i32, i32
  }
  func.func @transform_14(%arg0: i32) -> (i32, i32) {
    %c0_i32 = arith.constant 0 : i32
    %c0_i32_0 = arith.constant 0 : i32
    %c0_i32_1 = arith.constant 0 : i32
    return %c0_i32, %c0_i32_0 : i32, i32
  }
  func.func @transform_15(%arg0: i32) -> (i32, i32, i32) {
    %c0_i32 = arith.constant 0 : i32
    %c0_i32_0 = arith.constant 0 : i32
    %c0_i32_1 = arith.constant 0 : i32
    return %arg0, %c0_i32, %c0_i32_0 : i32, i32, i32
  }
}

</mosaic_0001>

<bundles_post_ra>
// kernel: tpu_custom_call.1
= control target key start
LH: loop header
LB: loop body
LE: loop exit
PB: predicated region body
PF: predicated region fallthrough
CT: control target
= control target key end

     0   :  { %s1779_s0 = inlined_call_operand.hbm [shape: f32[2,8,128], index: 0, kind: input, shape index: {}]   ;;  %s1780_s1 = inlined_call_operand.hbm [shape: f32[128,128], index: 1, kind: input, shape index: {}]   ;;  %s1781_s2 = inlined_call_operand.vmem [shape: f32[1,128], index: 2, kind: input, shape index: {}]   ;;  %s1782_s3 = inlined_call_operand.hbm [shape: f32[128,128], index: 3, kind: input, shape index: {}]   ;;  %s1783_s4 = inlined_call_operand.vmem [shape: f32[1,128], index: 4, kind: input, shape index: {}]   ;;  %s1784_s5 = inlined_call_operand.hbm [shape: f32[128,128], index: 5, kind: input, shape index: {}]   ;;  %s1785_s6 = inlined_call_operand.vmem [shape: f32[1,128], index: 6, kind: input, shape index: {}]   ;;  %s1786_s7 = inlined_call_operand.hbm [shape: f32[128,128], index: 7, kind: input, shape index: {}]   ;;  %s1787_s8 = inlined_call_operand.vmem [shape: f32[1,128], index: 8, kind: input, shape index: {}]   ;;  %s1788_s9 = inlined_call_operand.hbm [shape: f32[128,128], index: 9, kind: input, shape index: {}]   ;;  %s1789_s10 = inlined_call_operand.vmem [shape: f32[1,128], index: 10, kind: input, shape index: {}]   ;;  %s1790_s11 = inlined_call_operand.vmem [shape: f32[1,128], index: 11, kind: input, shape index: {}]   ;;  %s1791_s12 = inlined_call_operand.vmem [shape: f32[1,128], index: 12, kind: input, shape index: {}]   ;;  %s1792_s13 = inlined_call_operand.vmem [shape: f32[1,128], index: 13, kind: input, shape index: {}]   ;;  %s1793_s14 = inlined_call_operand.vmem [shape: f32[1,128], index: 14, kind: input, shape index: {}]   ;;  %s1794_s15 = inlined_call_operand.hbm [shape: f32[2,8,128], index: 15, kind: output, shape index: {}]  }
   0x1   :  { %1796 = sst [smem:[#allocation19_spill]] %s1780_s1 }
   0x2   :  { %1797 = sst [smem:[#allocation20_spill]] %s1782_s3 }
   0x3   :  { %1798 = sst [smem:[#allocation21_spill]] %s1784_s5 }
   0x4   :  { %1799 = sst [smem:[#allocation22_spill]] %s1786_s7 }
   0x5   :  { %1800 = sst [smem:[#allocation23_spill]] %s1788_s9 }
   0x6   :  { %1801 = sst [smem:[#allocation24_spill]] %s1789_s10 }
   0x7   :  { %1802 = sst [smem:[#allocation25_spill]] %s1792_s13 }
   0x8   :  { %1803 = sst [smem:[#allocation26_spill]] %s1793_s14 }
   0x9   :  { %1804 = sst [smem:[#allocation27_spill]] %s1794_s15 }
   0xa   :  { %20 = vsyncpa [#allocation3], 0 }
   0xb   :  { %22 = vsyncpa [#allocation3 + $0x1], 0 }
   0xc   :  { %23 = vsyncpa [#allocation6], 0 }
   0xd   :  { %24 = vsyncpa [#allocation9], 0 }
   0xe   :  { %25 = vsyncpa [#allocation12], 0 }
   0xf   :  { %26 = vsyncpa [#allocation4], 0 }
  0x10   :  { %28 = vsyncpa [#allocation4 + $0x1], 0  ;;  %s1555_s18 = smov 0   ;;  %s1557_s19 = smov 0  }
  0x11   :  { %s1559_s20 = smov 0   ;;  %s1561_s21 = smov 0  }
  0x12 LB: > { %s1805_s1 = sld [smem:[#allocation19_spill]]  ;;  %s1579_s25 = sadd.s32 4294967295, %s1466_s21   ;;  %s1466_s21 = sphi %s1561_s21, %s1824_s21   ;;  %s1462_s20 = sphi %s1559_s20, %s1823_s20   ;;  %s1458_s19 = sphi %s1557_s19, %s1822_s19   ;;  %s1454_s18 = sphi %s1555_s18, %s1821_s18  }
  0x13   : > { %p1070_p0 = scmp.ge.s32.totalorder %s1466_s21, 1  ;;  %p55_p1 = scmp.eq.s32.totalorder %s1579_s25, 0 }
  0x14   : > { %p385_p2 = scmp.lt.s32.totalorder %s1466_s21, 3  ;;  %s1468_s27 = smov [#allocation5]  }
  0x15   : > { %s398_s28 = sshll.u32 %s1468_s27, 4  ;;  %s1807_s5 = sld [smem:[#allocation21_spill]]  ;;  %s399_s28 = int_to_ptr.vmem [resolvable:$true] %s398_s28 }
  0x16   : > { %p1584_p3 = pnand %p1070_p0, %p385_p2  ;;  %s1809_s3 = sld [smem:[#allocation20_spill]] }
  0x17   : > { %s1470_s15 = smov 128   ;;  %s1471_s13 = smov 8  }
  0x18   : > { %s396_s24 = sshll.u32 %s1805_s1, 4  ;;  %p1116_p4 = pneg %p1584_p3  ;;  %s397_s24 = int_to_ptr.hbm [resolvable:$true] %s396_s24 }
  0x19   : > { %s1469_s1 = smov [#allocation8]   ;;  %s1810_s7 = sld [smem:[#allocation22_spill]] }
  0x1a   : > { %p1596_p6 = pnand %p1116_p4, %p55_p1  ;;  %s432_s14 = sshll.u32 %s1469_s1, 4  ;;  %s433_s14 = int_to_ptr.vmem [resolvable:$true] %s432_s14 }
  0x1b   : > { %s430_s16 = sshll.u32 %s1807_s5, 4  ;;  %s1472_s10 = smov [#allocation7]   ;;  %s431_s16 = int_to_ptr.hbm [resolvable:$true] %s430_s16 }
  0x1c   : > { %s413_s27 = sshll.u32 %s1809_s3, 4  ;;  %s415_s22 = sshll.u32 %s1472_s10, 4  ;;  %s414_s27 = int_to_ptr.hbm [resolvable:$true] %s413_s27  ;;  %s416_s22 = int_to_ptr.vmem [resolvable:$true] %s415_s22 }
  0x1d   : > { %1119 = dma.hbm_to_vmem [thread:$0]  (!%p1596_p6), %s397_s24, 2048, %s399_s28, [#allocation6], %s1470_s15, %s1470_s15, %s1471_s13  }
  0x1e   : > { %1125 = dma.hbm_to_vmem [thread:$0]  (!%p1596_p6), %s431_s16, 2048, %s433_s14, [#allocation9], %s1470_s15, %s1470_s15, %s1471_s13  }
  0x1f   : > { %s447_s5 = sshll.u32 %s1810_s7, 4  ;;  %s1473_s1 = smov [#allocation10]   ;;  %s448_s5 = int_to_ptr.hbm [resolvable:$true] %s447_s5 }
  0x20   : > { %1122 = dma.hbm_to_vmem [thread:$0]  (!%p1596_p6), %s414_s27, 2048, %s416_s22, [#allocation6], %s1470_s15, %s1470_s15, %s1471_s13  }
  0x21   : > { %s449_s14 = sshll.u32 %s1473_s1, 4  ;;  %s1811_s9 = sld [smem:[#allocation23_spill]]  ;;  %s450_s14 = int_to_ptr.vmem [resolvable:$true] %s449_s14 }
  0x22   : > { %1128 = dma.hbm_to_vmem [thread:$0]  (!%p1596_p6), %s448_s5, 2048, %s450_s14, [#allocation9], %s1470_s15, %s1470_s15, %s1471_s13  }
  0x23   : > { %s1474_s10 = smov [#allocation11]   ;;  %s1069_s27 = sadd.s32 4294967294, %s1466_s21  }
  0x24   : > { %s466_s23 = sshll.u32 %s1474_s10, 4  ;;  %s1621_s29 = sadd.s32 1, %s1466_s21   ;;  %s467_s23 = int_to_ptr.vmem [resolvable:$true] %s466_s23 }
  0x25   : > { %s41_s30 = sadd.s32 1, %s1462_s20  ;;  %s38_s22 = ssub.s32 %s1466_s21, %s1621_s29 }
  0x26   : > { %p48_p7 = scmp.ne.s32.totalorder %s1462_s20, %s1458_s19  ;;  %p39_p8 = scmp.eq.s32.totalorder %s38_s22, 0 }
  0x27   : > { %s464_s16 = sshll.u32 %s1811_s9, 4  ;;  %p49_p9 = scmp.eq.s32.totalorder %s1466_s21, 0  ;;  %s465_s16 = int_to_ptr.hbm [resolvable:$true] %s464_s16 }
  0x28   : > { %1131 = dma.hbm_to_vmem [thread:$0]  (!%p1596_p6), %s465_s16, 2048, %s467_s23, [#allocation12], %s1470_s15, %s1470_s15, %s1471_s13  }
  0x29   : > { %p54_p10 = scmp.ne.s32.totalorder %s1458_s19, %s1454_s18  ;;  %p372_p11 = scmp.eq.s32.totalorder %s1579_s25, 1 }
  0x2a   : > { %s1633_s5 = scalar_select %p39_p8, %s1462_s20, %s41_s30  }
  0x2b   : > { %p1637_p12 = por %p55_p1, %p54_p10  ;;  %p1641_p13 = por %p372_p11, %p48_p7 }
  0x2c   : > { %p378_p0 = scmp.eq.s32.totalorder %s1069_s27, 1  ;;  %p50_p2 = por %p49_p9, %p48_p7 }
  0x2d   : > { %s495_s15 = sand.u32 1, %s1462_s20   ;;  %p1145_p6 = scmp.lt.s32.totalorder %s1466_s21, 2 }
  0x2e   : > { %p1646_p4 = por %p378_p0, %p54_p10  ;;  %s1077_s14 = sshll.u32 %s495_s15, 3 }
  0x2f   : > { %s1078_s24 = sshll.u32 %s1466_s21, 3  ;;  %s499_s30 = scalar_lea.vmem [#allocation2], %s1077_s14 }
  0x30   : > { %s503_s10 = scalar_lea.hbm %s1779_s0, %s1078_s24  ;;  %s507_s22 = sshll.u32 %s499_s30, 4  ;;  %s508_s22 = int_to_ptr.vmem [resolvable:$true] %s507_s22 }
  0x31   : > { %s505_s23 = sshll.u32 %s503_s10, 4  ;;  %p1655_p8 = pnand %p1145_p6, %p50_p2  ;;  %s506_s23 = int_to_ptr.hbm [resolvable:$true] %s505_s23 }
  0x32   : > { %s496_s3 = scalar_lea.sflag [#allocation3], %s495_s15  ;;  %s1358_s7 = sshra.s32 %s506_s23, 4  ;;  %s1359_s7 = int_to_ptr.hbm [resolvable:$true] %s1358_s7 }
  0x33   : > { %s1360_s9 = scalar_lea.hbm %s1359_s7, 8  ;;  %p1362_p9 = pneg %p1655_p8 }
  0x34   : > { %p1361_p7 = scmp.ne.s32.totalorder %s1359_s7, %s1360_s9  ;;  %s1365_s14 = scalar_lea.hbm %s1779_s0, 16 }
  0x35   : > { %p1366_p0 = scmp.lt.s32.totalorder %s1359_s7, %s1779_s0  ;;  %p1367_p2 = scmp.lt.s32.totalorder %s1365_s14, %s1360_s9 }
  0x36   : > { %p1363_p10 = pnand %p1362_p9, %p1361_p7 }
  0x37   : > { %p1368_p6 = por %p1367_p2, %p1366_p0 }
  0x38   : > { %p1364_p11 = pneg %p1363_p10 }
  0x3a   : > { %p1369_p5 = pnand %p1368_p6, %p1364_p11 }
  0x3c   : > { %1372 = shalt.err (!%p1369_p5)
}
  0x3d   : > { %1135 = dma.hbm_to_vmem [thread:$0]  (!%p1655_p8), %s506_s23, 128, %s508_s22, %s496_s3  }
  0x3e   : > { %516 = sbr.rel (%p1584_p3) target bundleno = 1570 (0x622), region = 80  ;;  %s1672_s15 = sand.u32 (!%p1584_p3), 1, %s1458_s19  }
  0x3f   : > { %s1080_s30 = sshll.u32 (!%p1584_p3), %s1672_s15, 3  ;;  %s519_s24 = scalar_lea.sflag (!%p1584_p3), [#allocation3], %s1672_s15 }
  0x40   : > { %s1678_s7 = scalar_lea.vmem (!%p1584_p3), [#allocation2], %s1080_s30 }
  0x43   : > { %1433 = dma.done.wait (%p1637_p12), %s519_s24, 128  }
  0x44   : > { %1435 = vsyncadd (%p1637_p12), %s519_s24, 4294967168 }
  0x45   : > { %1437 = dma.done.wait (%p55_p1), [#allocation6], 4096  }
  0x46   : > { %1439 = vsyncadd (%p55_p1), [#allocation6], 4294963200 }
  0x47   : > { %1441 = dma.done.wait (%p55_p1), [#allocation9], 4096  }
  0x48   : > { %1443 = vsyncadd (%p55_p1), [#allocation9], 4294963200 }
  0x49   : > { %1445 = dma.done.wait (%p55_p1), [#allocation12], 2048  }
  0x4a   : > { %1447 = vsyncadd (%p55_p1), [#allocation12], 4294965248  ;;  %v655_v0 = vld [vmem:[#allocation7 + $0x78] sm:$0xff]  ;;  %v654_v2 = vld [vmem:[#allocation7 + $0x70] sm:$0xff]  ;;  %vm700_vm0 = vcmask 64512   ;;  %s1816_s9 = sld [smem:[#allocation24_spill]] }
  0x4b   : > { %v614_v1 = vld [vmem:[#allocation5 + $0x78] sm:$0xff]  ;;  %660 = vmatpush.msra.mxu1 %v655_v0  ;;  %v613_v3 = vld [vmem:[#allocation5 + $0x70] sm:$0xff]  ;;  %v653_v4 = vld [vmem:[#allocation7 + $0x68] sm:$0xff]  ;;  %s1089_s26 = sshll.u32 %s1579_s25, 3  ;;  %s1817_s22 = sld [smem:[#allocation25_spill]] }
  0x4c   : > { %619 = vmatpush.msra.mxu0 %v614_v1  ;;  %v612_v5 = vld [vmem:[#allocation5 + $0x68] sm:$0xff]  ;;  %v652_v6 = vld [vmem:[#allocation7 + $0x60] sm:$0xff]  ;;  %v651_v8 = vld [vmem:[#allocation7 + $0x58] sm:$0xff]  ;;  %s1818_s14 = sld [smem:[#allocation27_spill]]  ;;  %s594_s25 = scalar_lea.vmem [#allocation13], %s1080_s30 }
  0x4d   : > { %661 = vmatpush.msra.mxu1 %v654_v2  ;;  %v611_v7 = vld [vmem:[#allocation5 + $0x60] sm:$0xff]  ;;  %v610_v9 = vld [vmem:[#allocation5 + $0x58] sm:$0xff]  ;;  %v650_v10 = vld [vmem:[#allocation7 + $0x50] sm:$0xff]  ;;  %s948_s3 = sshll.u32 %s594_s25, 4  ;;  %s936_s17 = scalar_lea.sflag [#allocation4], %s1672_s15  ;;  %s949_s3 = int_to_ptr.vmem [resolvable:$true] %s948_s3 }
  0x4e   : > { %620 = vmatpush.msra.mxu0 %v613_v3  ;;  %v609_v11 = vld [vmem:[#allocation5 + $0x50] sm:$0xff]  ;;  %v649_v12 = vld [vmem:[#allocation7 + $0x48] sm:$0xff]  ;;  %v648_v14 = vld [vmem:[#allocation7 + $0x40] sm:$0xff] }
  0x4f   : > { %662 = vmatpush.msra.mxu1 %v653_v4  ;;  %v608_v13 = vld [vmem:[#allocation5 + $0x48] sm:$0xff]  ;;  %v607_v15 = vld [vmem:[#allocation5 + $0x40] sm:$0xff]  ;;  %v647_v16 = vld [vmem:[#allocation7 + $0x38] sm:$0xff] }
  0x50   : > { %621 = vmatpush.msra.mxu0 %v612_v5  ;;  %v606_v17 = vld [vmem:[#allocation5 + $0x38] sm:$0xff]  ;;  %v646_v18 = vld [vmem:[#allocation7 + $0x30] sm:$0xff]  ;;  %v645_v20 = vld [vmem:[#allocation7 + $0x28] sm:$0xff] }
  0x51   : > { %663 = vmatpush.msra.mxu1 %v652_v6  ;;  %v605_v19 = vld [vmem:[#allocation5 + $0x30] sm:$0xff]  ;;  %v604_v21 = vld [vmem:[#allocation5 + $0x28] sm:$0xff]  ;;  %v644_v22 = vld [vmem:[#allocation7 + $0x20] sm:$0xff] }
  0x52   : > { %622 = vmatpush.msra.mxu0 %v611_v7  ;;  %v603_v23 = vld [vmem:[#allocation5 + $0x20] sm:$0xff]  ;;  %v643_v24 = vld [vmem:[#allocation7 + $0x18] sm:$0xff]  ;;  %v642_v26 = vld [vmem:[#allocation7 + $0x10] sm:$0xff]  ;;  %s946_s16 = scalar_lea.hbm %s1818_s14, %s1089_s26  ;;  %s1408_s28 = scalar_lea.hbm %s1818_s14, 16 }
  0x53   : > { %664 = vmatpush.msra.mxu1 %v651_v8  ;;  %v602_v25 = vld [vmem:[#allocation5 + $0x18] sm:$0xff]  ;;  %v601_v27 = vld [vmem:[#allocation5 + $0x10] sm:$0xff]  ;;  %v641_v28 = vld [vmem:[#allocation7 + $0x8] sm:$0xff] }
  0x54   : > { %623 = vmatpush.msra.mxu0 %v610_v9  ;;  %v600_v29 = vld [vmem:[#allocation5 + $0x8] sm:$0xff]  ;;  %v640_v30 = vld [vmem:[#allocation7] sm:$0xff]  ;;  %v1697_v32 = vld [vmem:[%s1678_s7] sm:$0xff]  ;;  %s1819_s7 = sld [smem:[#allocation26_spill]] }
  0x55   : > { %665 = vmatpush.msra.mxu1 %v650_v10  ;;  %v599_v31 = vld [vmem:[#allocation5] sm:$0xff]  ;;  %v1191_v33 = vld [vmem:[%s1781_s2] ss:$0 sm:$0xff]  ;;  %v740_v40 = vld [vmem:[#allocation8 + $0x78] sm:$0xff] }
  0x56   : > { %624 = vmatpush.msra.mxu0 %v609_v11  ;;  %v1192_v34 = vld [vmem:[%s1783_s4] ss:$0 sm:$0xff]  ;;  %745 = vmatpush.msra.mxu3 %v740_v40  ;;  %v738_v42 = vld [vmem:[#allocation8 + $0x68] sm:$0xff]  ;;  %v737_v43 = vld [vmem:[#allocation8 + $0x60] sm:$0xff] }
  0x57   : > { %666 = vmatpush.msra.mxu1 %v649_v12  ;;  %v739_v41 = vld [vmem:[#allocation8 + $0x70] sm:$0xff]  ;;  %v736_v44 = vld [vmem:[#allocation8 + $0x58] sm:$0xff]  ;;  %v734_v46 = vld [vmem:[#allocation8 + $0x48] sm:$0xff] }
  0x58   : > { %625 = vmatpush.msra.mxu0 %v608_v13  ;;  %746 = vmatpush.msra.mxu3 %v739_v41  ;;  %v735_v45 = vld [vmem:[#allocation8 + $0x50] sm:$0xff]  ;;  %v733_v47 = vld [vmem:[#allocation8 + $0x40] sm:$0xff]  ;;  %v732_v48 = vld [vmem:[#allocation8 + $0x38] sm:$0xff] }
  0x59   : > { %667 = vmatpush.msra.mxu1 %v648_v14  ;;  %v731_v49 = vld [vmem:[#allocation8 + $0x30] sm:$0xff]  ;;  %v730_v50 = vld [vmem:[#allocation8 + $0x28] sm:$0xff]  ;;  %v729_v51 = vld [vmem:[#allocation8 + $0x20] sm:$0xff] }
  0x5a   : > { %626 = vmatpush.msra.mxu0 %v607_v15  ;;  %747 = vmatpush.msra.mxu3 %v738_v42  ;;  %v728_v52 = vld [vmem:[#allocation8 + $0x18] sm:$0xff]  ;;  %v727_v55 = vld [vmem:[#allocation8 + $0x10] sm:$0xff]  ;;  %v726_v56 = vld [vmem:[#allocation8 + $0x8] sm:$0xff] }
  0x5b   : > { %668 = vmatpush.msra.mxu1 %v647_v16  ;;  %v725_v57 = vld [vmem:[#allocation8] sm:$0xff]  ;;  %v1193_v63 = vld [vmem:[%s1785_s6] ss:$0 sm:$0xff]  ;;  %v836_v16 = vld [vmem:[#allocation10 + $0x78] sm:$0xff] }
  0x5c   : > { %627 = vmatpush.msra.mxu0 %v606_v17  ;;  %748 = vmatpush.msra.mxu3 %v737_v43  ;;  %v835_v17 = vld [vmem:[#allocation10 + $0x70] sm:$0xff]  ;;  %v875_v41 = vld [vmem:[#allocation11 + $0x68] sm:$0xff] }
  0x5d   : > { %669 = vmatpush.msra.mxu1 %v646_v18  ;;  %v595_v18 = vlaneseq  ;;  %v876_v40 = vld [vmem:[#allocation11 + $0x70] sm:$0xff] }
  0x5e   : > { %628 = vmatpush.msra.mxu0 %v605_v19  ;;  %749 = vmatpush.msra.mxu3 %v736_v44  ;;  %v874_v44 = vld [vmem:[#allocation11 + $0x60] sm:$0xff] }
  0x5f   : > { %670 = vmatpush.msra.mxu1 %v645_v20  ;;  %v1715_v19 = vand.u32 127, %v595_v18 }
  0x60   : > { %629 = vmatpush.msra.mxu0 %v604_v21  ;;  %750 = vmatpush.msra.mxu3 %v735_v45 }
  0x61   : > { %671 = vmatpush.msra.mxu1 %v644_v22  ;;  %vm597_vm5 = vcmp.lt.s32.totalorder %v1715_v19, 32  ;;  %v1198_v19 = vld [vmem:[%s1817_s22] ss:$0 sm:$0xff] }
  0x62   : > { %630 = vmatpush.msra.mxu0 %v603_v23  ;;  %751 = vmatpush.msra.mxu3 %v734_v46  ;;  %v873_v46 = vld [vmem:[#allocation11 + $0x58] sm:$0xff] }
  0x63   : > { %672 = vmatpush.msra.mxu1 %v643_v24 }
  0x64   : > { %631 = vmatpush.msra.mxu0 %v602_v25  ;;  %752 = vmatpush.msra.mxu3 %v733_v47  ;;  %v834_v25 = vld [vmem:[#allocation10 + $0x68] sm:$0xff]  ;;  %v872_v47 = vld [vmem:[#allocation11 + $0x50] sm:$0xff] }
  0x65   : > { %673 = vmatpush.msra.mxu1 %v642_v26  ;;  %v833_v26 = vld [vmem:[#allocation10 + $0x60] sm:$0xff] }
  0x66   : > { %632 = vmatpush.msra.mxu0 %v601_v27  ;;  %753 = vmatpush.msra.mxu3 %v732_v48  ;;  %v832_v27 = vld [vmem:[#allocation10 + $0x58] sm:$0xff]  ;;  %v871_v48 = vld [vmem:[#allocation11 + $0x48] sm:$0xff] }
  0x67   : > { %674 = vmatpush.msra.mxu1 %v641_v28  ;;  %v831_v28 = vld [vmem:[#allocation10 + $0x50] sm:$0xff] }
  0x68   : > { %633 = vmatpush.msra.mxu0 %v600_v29  ;;  %754 = vmatpush.msra.mxu3 %v731_v49  ;;  %v830_v29 = vld [vmem:[#allocation10 + $0x48] sm:$0xff]  ;;  %v870_v49 = vld [vmem:[#allocation11 + $0x40] sm:$0xff] }
  0x69   : > { %675 = vmatpush.msra.mxu1 %v640_v30  ;;  %v829_v30 = vld [vmem:[#allocation10 + $0x40] sm:$0xff] }
  0x6a   : > { %634 = vmatpush.msra.mxu0 %v599_v31  ;;  %676 = vmatmul.f32.vlgmr.msra.gmra.mxu1 %v1697_v32  ;;  %v828_v31 = vld [vmem:[#allocation10 + $0x38] sm:$0xff] }
  0x6b   : > { %635 = vmatmul.f32.vlgmr.msra.gmra.mxu0 %v1697_v32  ;;  %755 = vmatpush.msra.mxu3 %v730_v50 }
  0x6d   : > { %756 = vmatpush.msra.mxu3 %v729_v51  ;;  %v869_v51 = vld [vmem:[#allocation11 + $0x38] sm:$0xff] }
  0x6f   : > { %757 = vmatpush.msra.mxu3 %v728_v52 }
  0x71   : > { %758 = vmatpush.msra.mxu3 %v727_v55  ;;  %v867_v55 = vld [vmem:[#allocation11 + $0x28] sm:$0xff] }
  0x73   : > { %759 = vmatpush.msra.mxu3 %v726_v56 }
  0x75   : > { %760 = vmatpush.msra.mxu3 %v725_v57  ;;  %v866_v57 = vld [vmem:[#allocation11 + $0x20] sm:$0xff] }
  0x76   : > { %761 = vmatmul.f32.vlgmr.msra.gmra.mxu3 %v1697_v32 }
  0xe7   : > { %v677_v35 = vpop.f32.mrf.mxu1 }
  0xe8   : > { %v636_v36 = vpop.f32.mrf.mxu0  ;;  %v678_v38 = vadd.f32 %v1192_v34, %v677_v35  ;;  %v825_v34 = vld [vmem:[#allocation10 + $0x20] sm:$0xff]  ;;  %v824_v35 = vld [vmem:[#allocation10 + $0x18] sm:$0xff] }
  0xe9   : > { %v637_v37 = vadd.f32 %v1191_v33, %v636_v36  ;;  %v826_v33 = vld [vmem:[#allocation10 + $0x28] sm:$0xff]  ;;  %v823_v36 = vld [vmem:[#allocation10 + $0x10] sm:$0xff] }
  0xea   : > { %695 = vmatpush.xpose.msra.mxu2 %v678_v38  ;;  %v821_v38 = vld [vmem:[#allocation10] sm:$0xff] }
  0xeb   : > { %v639_v39 = vmul.f32 0.17677669, %v637_v37  ;;  %v822_v37 = vld [vmem:[#allocation10 + $0x8] sm:$0xff] }
  0xed   : > { %696 = vmatmul.f32.vlgmr.msra.gmra.mxu2 %v639_v39  ;;  %v877_v39 = vld [vmem:[#allocation11 + $0x78] sm:$0xff] }
  0xee   : > { %882 = vmatpush.msrb.mxu0 %v877_v39 }
  0xf0   : > { %883 = vmatpush.msrb.mxu0 %v876_v40 }
  0xf2   : > { %884 = vmatpush.msrb.mxu0 %v875_v41 }
  0xf4   : > { %885 = vmatpush.msrb.mxu0 %v874_v44 }
  0xf6   : > { %886 = vmatpush.msrb.mxu0 %v873_v46 }
  0xf8   : > { %887 = vmatpush.msrb.mxu0 %v872_v47 }
  0xf9   : > { %v762_v0 = vpop.f32.mrf.mxu3 }
  0xfa   : > { %v763_v1 = vadd.f32 %v1193_v63, %v762_v0  ;;  %888 = vmatpush.msrb.mxu0 %v871_v48  ;;  %v1195_v0 = vld [vmem:[%s1791_s12] ss:$0 sm:$0xff] }
  0xfc   : > { %783 = vmatpush.msrb.mxu2 %v763_v1  ;;  %889 = vmatpush.msrb.mxu0 %v870_v49 }
  0xfe   : > { %841 = vmatpush.msra.mxu2 %v836_v16  ;;  %890 = vmatpush.msrb.mxu0 %v869_v51 }
 0x100   : > { %842 = vmatpush.msra.mxu2 %v835_v17 }
 0x102   : > { %843 = vmatpush.msra.mxu2 %v834_v25 }
 0x104   : > { %844 = vmatpush.msra.mxu2 %v833_v26 }
 0x106   : > { %845 = vmatpush.msra.mxu2 %v832_v27 }
 0x108   : > { %846 = vmatpush.msra.mxu2 %v831_v28 }
 0x10a   : > { %847 = vmatpush.msra.mxu2 %v830_v29 }
 0x10c   : > { %848 = vmatpush.msra.mxu2 %v829_v30 }
 0x10e   : > { %849 = vmatpush.msra.mxu2 %v828_v31  ;;  %v1199_v31 = vld [vmem:[%s1819_s7] ss:$0 sm:$0xff] }
 0x170   : > { %v697_v53 = vpop.f32.mrf.mxu2 }
 0x171   : > { %v701_v54 = vsel %vm700_vm0, %v697_v53, -inf }
 0x172   : > { %702 = vmax.xlane.f32.xlu0 %v701_v54 }
 0x1e5   : > { %v703_v58 = vpop.xlane.xlu0 %702 }
 0x1e6   : > { %v704_v59 = vsub.f32 %v697_v53, %v703_v58  ;;  %v868_v53 = vld [vmem:[#allocation11 + $0x30] sm:$0xff] }
 0x1e7   : > { %891 = vmatpush.msrb.mxu0 %v868_v53 }
 0x1e8   : > { %v705_v60 = vmul.f32 1.442695, %v704_v59  ;;  %v865_v59 = vld [vmem:[#allocation11 + $0x18] sm:$0xff] }
 0x1e9   : > { %892 = vmatpush.msrb.mxu0 %v867_v55 }
 0x1ea   : > { %1200 = vpow2.f32 %v705_v60 }
 0x1eb   : > { %893 = vmatpush.msrb.mxu0 %v866_v57 }
 0x1ed   : > { %894 = vmatpush.msrb.mxu0 %v865_v59 }
 0x1f0   : > { %v1201_v61 = vpop.eup %1200 }
 0x1f1   : > { %v707_v62 = vsel %vm700_vm0, %v1201_v61, 0.0 }
 0x1f2   : > { %708 = vadd.xlane.f32.xlu0 %v707_v62 }
 0x265   : > { %v709_v2 = vpop.xlane.xlu0 %708 }
 0x266   : > { %1202 = vrcp.f32 %v709_v2  ;;  %v721_v6 = vand.u32 2147483648, %v709_v2  ;;  %v719_v8 = vand.u32 2147483647, %v709_v2  ;;  %vm715_vm2 = vweird.f32 %v709_v2 }
 0x268   : > { %v722_v10 = vor.u32 1.1754944e-38, %v721_v6  ;;  %vm720_vm4 = vcmp.eq.f32.partialorder %v719_v8, 8.507059e+37  ;;  %v1196_v6 = vld [vmem:[%s1787_s8] ss:$0 sm:$0xff] }
 0x26c   : > { %v1203_v3 = vpop.eup %1202 }
 0x26d   : > { %v711_v4 = vmul.f32 %v1203_v3, %v709_v2  ;;  %vm716_vm1 = vweird.f32 %v1203_v3 }
 0x26e   : > { %vm717_vm3 = vmor %vm715_vm2, %vm716_vm1 }
 0x26f   : > { %v712_v5 = vsub.f32 1.0, %v711_v4  ;;  %v863_v4 = vld [vmem:[#allocation11 + $0x8] sm:$0xff] }
 0x271   : > { %v713_v7 = vmul.f32 %v1203_v3, %v712_v5  ;;  %v862_v5 = vld [vmem:[#allocation11] sm:$0xff] }
 0x273   : > { %v714_v9 = vadd.f32 %v1203_v3, %v713_v7 }
 0x275   : > { %v718_v11 = vsel %vm717_vm3, %v1203_v3, %v714_v9  ;;  %v864_v3 = vld [vmem:[#allocation11 + $0x10] sm:$0xff] }
 0x276   : > { %v723_v12 = vsel %vm720_vm4, %v722_v10, %v718_v11  ;;  %895 = vmatpush.msrb.mxu0 %v864_v3  ;;  %v1197_v10 = vld [vmem:[%s1816_s9] ss:$0 sm:$0xff]  ;;  %s950_s9 = sshll.u32 %s946_s16, 4  ;;  %s951_s9 = int_to_ptr.hbm [resolvable:$true] %s950_s9 }
 0x277   : > { %v724_v13 = vmul.f32 %v1201_v61, %v723_v12  ;;  %v1194_v61 = vld [vmem:[%s1790_s11] ss:$0 sm:$0xff]  ;;  %s1402_s23 = sshra.s32 %s951_s9, 4  ;;  %s1403_s23 = int_to_ptr.hbm [resolvable:$true] %s1402_s23 }
 0x278   : > { %896 = vmatpush.msrb.mxu0 %v863_v4  ;;  %s1404_s26 = scalar_lea.hbm %s1403_s23, 8  ;;  %p1409_p12 = scmp.lt.s32.totalorder %s1403_s23, %s1818_s14 }
 0x279   : > { %1087 = vmatmul.msk.f32.vlgmr.msrb.gmra.mxu2 %vm700_vm0, %v724_v13  ;;  %p1405_p1 = scmp.ne.s32.totalorder %s1403_s23, %s1404_s26  ;;  %p1410_p8 = scmp.lt.s32.totalorder %s1408_s28, %s1404_s26 }
 0x27a   : > { %897 = vmatpush.msrb.mxu0 %v862_v5 }
 0x27b   : > { %p1406_p3 = pnand %p1405_p1, %p1641_p13  ;;  %p1411_p7 = por %p1410_p8, %p1409_p12 }
 0x27d   : > { %p1407_p5 = pneg %p1406_p3 }
 0x27f   : > { %p1412_p9 = pnand %p1411_p7, %p1407_p5 }
 0x2fc   : > { %v785_v14 = vpop.f32.mrf.mxu2 }
 0x2fd   : > { %v786_v15 = vadd.f32 %v785_v14, %v1697_v32  ;;  %v827_v32 = vld [vmem:[#allocation10 + $0x30] sm:$0xff] }
 0x2fe   : > { %850 = vmatpush.msra.mxu2 %v827_v32 }
 0x2ff   : > { %790 = vadd.xlane.f32.xlu1 %v786_v15 }
 0x300   : > { %851 = vmatpush.msra.mxu2 %v826_v33 }
 0x302   : > { %852 = vmatpush.msra.mxu2 %v825_v34 }
 0x304   : > { %853 = vmatpush.msra.mxu2 %v824_v35 }
 0x306   : > { %854 = vmatpush.msra.mxu2 %v823_v36 }
 0x308   : > { %855 = vmatpush.msra.mxu2 %v822_v37 }
 0x30a   : > { %856 = vmatpush.msra.mxu2 %v821_v38 }
 0x372   : > { %v791_v20 = vpop.xlane.xlu1 %790 }
 0x373   : > { %v792_v21 = vmul.f32 0.03125, %v791_v20 }
 0x375   : > { %v1718_v22 = vsub.f32 %v786_v15, %v792_v21 }
 0x377   : > { %v796_v23 = vsel %vm597_vm5, %v1718_v22, 0.0 }
 0x378   : > { %v797_v24 = vmul.f32 %v796_v23, %v796_v23 }
 0x37a   : > { %798 = vadd.xlane.f32.xlu1 %v797_v24 }
 0x3ed   : > { %v799_v42 = vpop.xlane.xlu1 %798 }
 0x3ee   : > { %v800_v43 = vmul.f32 0.03125, %v799_v42 }
 0x3f0   : > { %v801_v45 = vadd.f32 1e-05, %v800_v43 }
 0x3f2   : > { %1204 = vrsqrt.f32 %v801_v45  ;;  %vm808_vm7 = vweird.f32 %v801_v45 }
 0x3f8   : > { %v1205_v50 = vpop.eup %1204 }
 0x3f9   : > { %v803_v52 = vmul.f32 %v1205_v50, %v801_v45  ;;  %vm809_vm6 = vweird.f32 %v1205_v50 }
 0x3fa   : > { %vm810_vm8 = vmor %vm808_vm7, %vm809_vm6 }
 0x3fb   : > { %v804_v54 = vmul.f32 %v1205_v50, %v803_v52 }
 0x3fd   : > { %v805_v56 = vmul.f32 0.5, %v804_v54 }
 0x3ff   : > { %v806_v58 = vsub.f32 1.5, %v805_v56 }
 0x401   : > { %v807_v60 = vmul.f32 %v1205_v50, %v806_v58 }
 0x403   : > { %v811_v62 = vsel %vm810_vm8, %v1205_v50, %v807_v60 }
 0x404   : > { %v812_v63 = vmul.f32 %v811_v62, %v1718_v22 }
 0x406   : > { %v816_v1 = vmul.f32 %v1194_v61, %v812_v63 }
 0x408   : > { %v820_v2 = vadd.f32 %v1195_v0, %v816_v1 }
 0x40a   : > { %857 = vmatmul.f32.vlgmr.msra.gmra.mxu2 %v820_v2 }
 0x48d   : > { %v858_v7 = vpop.f32.mrf.mxu2 }
 0x48e   : > { %v859_v8 = vadd.f32 %v1196_v6, %v858_v7 }
 0x490   : > { %v861_v9 = vmax.f32 %v859_v8, 0.0 }
 0x492   : > { %898 = vmatmul.f32.vlgmr.msrb.gmra.mxu0 %v861_v9 }
 0x50f   : > { %v899_v11 = vpop.f32.mrf.mxu0 }
 0x510   : > { %v900_v12 = vadd.f32 %v1197_v10, %v899_v11 }
 0x512   : > { %v902_v13 = vadd.f32 %v900_v12, %v820_v2 }
 0x514   : > { %905 = vadd.xlane.f32.xlu2 %v902_v13 }
 0x587   : > { %v906_v14 = vpop.xlane.xlu2 %905 }
 0x588   : > { %v907_v15 = vmul.f32 0.03125, %v906_v14 }
 0x58a   : > { %v908_v16 = vsub.f32 %v902_v13, %v907_v15 }
 0x58c   : > { %v909_v17 = vsel %vm597_vm5, %v908_v16, 0.0 }
 0x58d   : > { %v910_v18 = vmul.f32 %v909_v17, %v909_v17 }
 0x58f   : > { %911 = vadd.xlane.f32.xlu2 %v910_v18 }
 0x602   : > { %v912_v20 = vpop.xlane.xlu2 %911 }
 0x603   : > { %v913_v21 = vmul.f32 0.03125, %v912_v20 }
 0x605   : > { %v914_v22 = vadd.f32 1e-05, %v913_v21 }
 0x607   : > { %1206 = vrsqrt.f32 %v914_v22  ;;  %vm921_vm10 = vweird.f32 %v914_v22 }
 0x60d   : > { %v1207_v23 = vpop.eup %1206 }
 0x60e   : > { %v916_v24 = vmul.f32 %v1207_v23, %v914_v22  ;;  %vm922_vm9 = vweird.f32 %v1207_v23 }
 0x60f   : > { %vm923_vm11 = vmor %vm921_vm10, %vm922_vm9 }
 0x610   : > { %v917_v25 = vmul.f32 %v1207_v23, %v916_v24 }
 0x612   : > { %v918_v26 = vmul.f32 0.5, %v917_v25 }
 0x614   : > { %v919_v27 = vsub.f32 1.5, %v918_v26 }
 0x616   : > { %v920_v28 = vmul.f32 %v1207_v23, %v919_v27 }
 0x618   : > { %v924_v29 = vsel %vm923_vm11, %v1207_v23, %v920_v28 }
 0x619   : > { %v925_v30 = vmul.f32 %v924_v29, %v908_v16 }
 0x61b   : > { %v929_v32 = vmul.f32 %v1198_v19, %v925_v30 }
 0x61d   : > { %v933_v33 = vadd.f32 %v1199_v31, %v929_v32 }
 0x61f   : > { %934 = vst [vmem:[%s594_s25] sm:$0xff] %v933_v33 }
 0x620   : > { %1415 = shalt.err (!%p1412_p9)
}
 0x621   : > { %1114 = dma.vmem_to_hbm [thread:$0]  (%p1641_p13), %s949_s3, 128, %s951_s9, %s936_s17  }
 0x622 PF: > { %s962_s15 = sand.u32 1, %s1454_s18   ;;  %p1820_p10 = scmp.ge.s32.totalorder %s1466_s21, 2 }
 0x623   : > { %s963_s16 = scalar_lea.sflag [#allocation4], %s962_s15 }
 0x624   : > { %p1137_p11 = pnand %p1820_p10, %p1646_p4 }
 0x626   : > { %p1138_p0 = pneg %p1137_p11 }
 0x628   : > { %1449 = dma.done.wait (%p1138_p0), %s963_s16, 128  }
 0x629   : > { %1451 = vsyncadd (%p1138_p0), %s963_s16, 4294967168  ;;  %p31_p2 = scmp.ge.s32.totalorder %s1621_s29, 4   ;;  %s1821_s18 = smov %s1458_s19 }
 0x62a   : > { %s1822_s19 = smov %s1462_s20  ;;  %s1823_s20 = smov %s1633_s5 }
 0x62b   : > { %s1824_s21 = smov %s1621_s29  ;;  %33 = sbr.rel (!%p31_p2) target bundleno = 18 (0x12), region = 145 }
 0x630   :  { %969 = vsyncpa [#allocation3], 1 }
 0x631   :  { %971 = vsyncpa [#allocation3 + $0x1], 1 }
 0x632   :  { %972 = vsyncpa [#allocation6], 1 }
 0x633   :  { %973 = vsyncpa [#allocation9], 1 }
 0x634   :  { %974 = vsyncpa [#allocation12], 1 }
 0x635   :  { %975 = vsyncpa [#allocation4], 1 }
 0x636   :  { %977 = vsyncpa [#allocation4 + $0x1], 1 }

// kernel: tpu_custom_call.1
= control target key start
LH: loop header
LB: loop body
LE: loop exit
PB: predicated region body
PF: predicated region fallthrough
CT: control target
= control target key end

     0   :  { %s1779_s0 = inlined_call_operand.hbm [shape: f32[2,8,128], index: 0, kind: input, shape index: {}]   ;;  %s1780_s1 = inlined_call_operand.hbm [shape: f32[128,128], index: 1, kind: input, shape index: {}]   ;;  %s1781_s2 = inlined_call_operand.vmem [shape: f32[1,128], index: 2, kind: input, shape index: {}]   ;;  %s1782_s3 = inlined_call_operand.hbm [shape: f32[128,128], index: 3, kind: input, shape index: {}]   ;;  %s1783_s4 = inlined_call_operand.vmem [shape: f32[1,128], index: 4, kind: input, shape index: {}]   ;;  %s1784_s5 = inlined_call_operand.hbm [shape: f32[128,128], index: 5, kind: input, shape index: {}]   ;;  %s1785_s6 = inlined_call_operand.vmem [shape: f32[1,128], index: 6, kind: input, shape index: {}]   ;;  %s1786_s7 = inlined_call_operand.hbm [shape: f32[128,128], index: 7, kind: input, shape index: {}]   ;;  %s1787_s8 = inlined_call_operand.vmem [shape: f32[1,128], index: 8, kind: input, shape index: {}]   ;;  %s1788_s9 = inlined_call_operand.hbm [shape: f32[128,128], index: 9, kind: input, shape index: {}]   ;;  %s1789_s10 = inlined_call_operand.vmem [shape: f32[1,128], index: 10, kind: input, shape index: {}]   ;;  %s1790_s11 = inlined_call_operand.vmem [shape: f32[1,128], index: 11, kind: input, shape index: {}]   ;;  %s1791_s12 = inlined_call_operand.vmem [shape: f32[1,128], index: 12, kind: input, shape index: {}]   ;;  %s1792_s13 = inlined_call_operand.vmem [shape: f32[1,128], index: 13, kind: input, shape index: {}]   ;;  %s1793_s14 = inlined_call_operand.vmem [shape: f32[1,128], index: 14, kind: input, shape index: {}]   ;;  %s1794_s15 = inlined_call_operand.hbm [shape: f32[2,8,128], index: 15, kind: output, shape index: {}]  }
   0x1   :  { %1796 = sst [smem:[#allocation19_spill]] %s1780_s1 }
   0x2   :  { %1797 = sst [smem:[#allocation20_spill]] %s1782_s3 }
   0x3   :  { %1798 = sst [smem:[#allocation21_spill]] %s1784_s5 }
   0x4   :  { %1799 = sst [smem:[#allocation22_spill]] %s1786_s7 }
   0x5   :  { %1800 = sst [smem:[#allocation23_spill]] %s1788_s9 }
   0x6   :  { %1801 = sst [smem:[#allocation24_spill]] %s1789_s10 }
   0x7   :  { %1802 = sst [smem:[#allocation25_spill]] %s1792_s13 }
   0x8   :  { %1803 = sst [smem:[#allocation26_spill]] %s1793_s14 }
   0x9   :  { %1804 = sst [smem:[#allocation27_spill]] %s1794_s15 }
   0xa   :  { %20 = vsyncpa [#allocation3], 0 }
   0xb   :  { %22 = vsyncpa [#allocation3 + $0x1], 0 }
   0xc   :  { %23 = vsyncpa [#allocation6], 0 }
   0xd   :  { %24 = vsyncpa [#allocation9], 0 }
   0xe   :  { %25 = vsyncpa [#allocation12], 0 }
   0xf   :  { %26 = vsyncpa [#allocation4], 0 }
  0x10   :  { %28 = vsyncpa [#allocation4 + $0x1], 0  ;;  %s1555_s18 = smov 0   ;;  %s1557_s19 = smov 0  }
  0x11   :  { %s1559_s20 = smov 0   ;;  %s1561_s21 = smov 0  }
  0x12 LB: > { %s1805_s1 = sld [smem:[#allocation19_spill]]  ;;  %s1579_s25 = sadd.s32 4294967295, %s1466_s21   ;;  %s1466_s21 = sphi %s1561_s21, %s1824_s21   ;;  %s1462_s20 = sphi %s1559_s20, %s1823_s20   ;;  %s1458_s19 = sphi %s1557_s19, %s1822_s19   ;;  %s1454_s18 = sphi %s1555_s18, %s1821_s18  }
  0x13   : > { %p1070_p0 = scmp.ge.s32.totalorder %s1466_s21, 1  ;;  %p55_p1 = scmp.eq.s32.totalorder %s1579_s25, 0 }
  0x14   : > { %p385_p2 = scmp.lt.s32.totalorder %s1466_s21, 3  ;;  %s1468_s27 = smov [#allocation5]  }
  0x15   : > { %s398_s28 = sshll.u32 %s1468_s27, 4  ;;  %s1807_s5 = sld [smem:[#allocation21_spill]]  ;;  %s399_s28 = int_to_ptr.vmem [resolvable:$true] %s398_s28 }
  0x16   : > { %p1584_p3 = pnand %p1070_p0, %p385_p2  ;;  %s1809_s3 = sld [smem:[#allocation20_spill]] }
  0x17   : > { %s1470_s15 = smov 128   ;;  %s1471_s13 = smov 8  }
  0x18   : > { %s396_s24 = sshll.u32 %s1805_s1, 4  ;;  %p1116_p4 = pneg %p1584_p3  ;;  %s397_s24 = int_to_ptr.hbm [resolvable:$true] %s396_s24 }
  0x19   : > { %s1469_s1 = smov [#allocation8]   ;;  %s1810_s7 = sld [smem:[#allocation22_spill]] }
  0x1a   : > { %p1596_p6 = pnand %p1116_p4, %p55_p1  ;;  %s432_s14 = sshll.u32 %s1469_s1, 4  ;;  %s433_s14 = int_to_ptr.vmem [resolvable:$true] %s432_s14 }
  0x1b   : > { %s430_s16 = sshll.u32 %s1807_s5, 4  ;;  %s1472_s10 = smov [#allocation7]   ;;  %s431_s16 = int_to_ptr.hbm [resolvable:$true] %s430_s16 }
  0x1c   : > { %s413_s27 = sshll.u32 %s1809_s3, 4  ;;  %s415_s22 = sshll.u32 %s1472_s10, 4  ;;  %s414_s27 = int_to_ptr.hbm [resolvable:$true] %s413_s27  ;;  %s416_s22 = int_to_ptr.vmem [resolvable:$true] %s415_s22 }
  0x1d   : > { %1119 = dma.hbm_to_vmem [thread:$0]  (!%p1596_p6), %s397_s24, 2048, %s399_s28, [#allocation6], %s1470_s15, %s1470_s15, %s1471_s13  }
  0x1e   : > { %1125 = dma.hbm_to_vmem [thread:$0]  (!%p1596_p6), %s431_s16, 2048, %s433_s14, [#allocation9], %s1470_s15, %s1470_s15, %s1471_s13  }
  0x1f   : > { %s447_s5 = sshll.u32 %s1810_s7, 4  ;;  %s1473_s1 = smov [#allocation10]   ;;  %s448_s5 = int_to_ptr.hbm [resolvable:$true] %s447_s5 }
  0x20   : > { %1122 = dma.hbm_to_vmem [thread:$0]  (!%p1596_p6), %s414_s27, 2048, %s416_s22, [#allocation6], %s1470_s15, %s1470_s15, %s1471_s13  }
  0x21   : > { %s449_s14 = sshll.u32 %s1473_s1, 4  ;;  %s1811_s9 = sld [smem:[#allocation23_spill]]  ;;  %s450_s14 = int_to_ptr.vmem [resolvable:$true] %s449_s14 }
  0x22   : > { %1128 = dma.hbm_to_vmem [thread:$0]  (!%p1596_p6), %s448_s5, 2048, %s450_s14, [#allocation9], %s1470_s15, %s1470_s15, %s1471_s13  }
  0x23   : > { %s1474_s10 = smov [#allocation11]   ;;  %s1069_s27 = sadd.s32 4294967294, %s1466_s21  }
  0x24   : > { %s466_s23 = sshll.u32 %s1474_s10, 4  ;;  %s1621_s29 = sadd.s32 1, %s1466_s21   ;;  %s467_s23 = int_to_ptr.vmem [resolvable:$true] %s466_s23 }
  0x25   : > { %s41_s30 = sadd.s32 1, %s1462_s20  ;;  %s38_s22 = ssub.s32 %s1466_s21, %s1621_s29 }
  0x26   : > { %p48_p7 = scmp.ne.s32.totalorder %s1462_s20, %s1458_s19  ;;  %p39_p8 = scmp.eq.s32.totalorder %s38_s22, 0 }
  0x27   : > { %s464_s16 = sshll.u32 %s1811_s9, 4  ;;  %p49_p9 = scmp.eq.s32.totalorder %s1466_s21, 0  ;;  %s465_s16 = int_to_ptr.hbm [resolvable:$true] %s464_s16 }
  0x28   : > { %1131 = dma.hbm_to_vmem [thread:$0]  (!%p1596_p6), %s465_s16, 2048, %s467_s23, [#allocation12], %s1470_s15, %s1470_s15, %s1471_s13  }
  0x29   : > { %p54_p10 = scmp.ne.s32.totalorder %s1458_s19, %s1454_s18  ;;  %p372_p11 = scmp.eq.s32.totalorder %s1579_s25, 1 }
  0x2a   : > { %s1633_s5 = scalar_select %p39_p8, %s1462_s20, %s41_s30  }
  0x2b   : > { %p1637_p12 = por %p55_p1, %p54_p10  ;;  %p1641_p13 = por %p372_p11, %p48_p7 }
  0x2c   : > { %p378_p0 = scmp.eq.s32.totalorder %s1069_s27, 1  ;;  %p50_p2 = por %p49_p9, %p48_p7 }
  0x2d   : > { %s495_s15 = sand.u32 1, %s1462_s20   ;;  %p1145_p6 = scmp.lt.s32.totalorder %s1466_s21, 2 }
  0x2e   : > { %p1646_p4 = por %p378_p0, %p54_p10  ;;  %s1077_s14 = sshll.u32 %s495_s15, 3 }
  0x2f   : > { %s1078_s24 = sshll.u32 %s1466_s21, 3  ;;  %s499_s30 = scalar_lea.vmem [#allocation2], %s1077_s14 }
  0x30   : > { %s503_s10 = scalar_lea.hbm %s1779_s0, %s1078_s24  ;;  %s507_s22 = sshll.u32 %s499_s30, 4  ;;  %s508_s22 = int_to_ptr.vmem [resolvable:$true] %s507_s22 }
  0x31   : > { %s505_s23 = sshll.u32 %s503_s10, 4  ;;  %p1655_p8 = pnand %p1145_p6, %p50_p2  ;;  %s506_s23 = int_to_ptr.hbm [resolvable:$true] %s505_s23 }
  0x32   : > { %s496_s3 = scalar_lea.sflag [#allocation3], %s495_s15  ;;  %s1358_s7 = sshra.s32 %s506_s23, 4  ;;  %s1359_s7 = int_to_ptr.hbm [resolvable:$true] %s1358_s7 }
  0x33   : > { %s1360_s9 = scalar_lea.hbm %s1359_s7, 8  ;;  %p1362_p9 = pneg %p1655_p8 }
  0x34   : > { %p1361_p7 = scmp.ne.s32.totalorder %s1359_s7, %s1360_s9  ;;  %s1365_s14 = scalar_lea.hbm %s1779_s0, 16 }
  0x35   : > { %p1366_p0 = scmp.lt.s32.totalorder %s1359_s7, %s1779_s0  ;;  %p1367_p2 = scmp.lt.s32.totalorder %s1365_s14, %s1360_s9 }
  0x36   : > { %p1363_p10 = pnand %p1362_p9, %p1361_p7 }
  0x37   : > { %p1368_p6 = por %p1367_p2, %p1366_p0 }
  0x38   : > { %p1364_p11 = pneg %p1363_p10 }
  0x3a   : > { %p1369_p5 = pnand %p1368_p6, %p1364_p11 }
  0x3c   : > { %1372 = shalt.err (!%p1369_p5)
}
  0x3d   : > { %1135 = dma.hbm_to_vmem [thread:$0]  (!%p1655_p8), %s506_s23, 128, %s508_s22, %s496_s3  }
  0x3e   : > { %516 = sbr.rel (%p1584_p3) target bundleno = 1570 (0x622), region = 80  ;;  %s1672_s15 = sand.u32 (!%p1584_p3), 1, %s1458_s19  }
  0x3f   : > { %s1080_s30 = sshll.u32 (!%p1584_p3), %s1672_s15, 3  ;;  %s519_s24 = scalar_lea.sflag (!%p1584_p3), [#allocation3], %s1672_s15 }
  0x40   : > { %s1678_s7 = scalar_lea.vmem (!%p1584_p3), [#allocation2], %s1080_s30 }
  0x43   : > { %1433 = dma.done.wait (%p1637_p12), %s519_s24, 128  }
  0x44   : > { %1435 = vsyncadd (%p1637_p12), %s519_s24, 4294967168 }
  0x45   : > { %1437 = dma.done.wait (%p55_p1), [#allocation6], 4096  }
  0x46   : > { %1439 = vsyncadd (%p55_p1), [#allocation6], 4294963200 }
  0x47   : > { %1441 = dma.done.wait (%p55_p1), [#allocation9], 4096  }
  0x48   : > { %1443 = vsyncadd (%p55_p1), [#allocation9], 4294963200 }
  0x49   : > { %1445 = dma.done.wait (%p55_p1), [#allocation12], 2048  }
  0x4a   : > { %1447 = vsyncadd (%p55_p1), [#allocation12], 4294965248  ;;  %v655_v0 = vld [vmem:[#allocation7 + $0x78] sm:$0xff]  ;;  %v654_v2 = vld [vmem:[#allocation7 + $0x70] sm:$0xff]  ;;  %vm700_vm0 = vcmask 64512   ;;  %s1816_s9 = sld [smem:[#allocation24_spill]] }
  0x4b   : > { %v614_v1 = vld [vmem:[#allocation5 + $0x78] sm:$0xff]  ;;  %660 = vmatpush.msra.mxu1 %v655_v0  ;;  %v613_v3 = vld [vmem:[#allocation5 + $0x70] sm:$0xff]  ;;  %v653_v4 = vld [vmem:[#allocation7 + $0x68] sm:$0xff]  ;;  %s1089_s26 = sshll.u32 %s1579_s25, 3  ;;  %s1817_s22 = sld [smem:[#allocation25_spill]] }
  0x4c   : > { %619 = vmatpush.msra.mxu0 %v614_v1  ;;  %v612_v5 = vld [vmem:[#allocation5 + $0x68] sm:$0xff]  ;;  %v652_v6 = vld [vmem:[#allocation7 + $0x60] sm:$0xff]  ;;  %v651_v8 = vld [vmem:[#allocation7 + $0x58] sm:$0xff]  ;;  %s1818_s14 = sld [smem:[#allocation27_spill]]  ;;  %s594_s25 = scalar_lea.vmem [#allocation13], %s1080_s30 }
  0x4d   : > { %661 = vmatpush.msra.mxu1 %v654_v2  ;;  %v611_v7 = vld [vmem:[#allocation5 + $0x60] sm:$0xff]  ;;  %v610_v9 = vld [vmem:[#allocation5 + $0x58] sm:$0xff]  ;;  %v650_v10 = vld [vmem:[#allocation7 + $0x50] sm:$0xff]  ;;  %s948_s3 = sshll.u32 %s594_s25, 4  ;;  %s936_s17 = scalar_lea.sflag [#allocation4], %s1672_s15  ;;  %s949_s3 = int_to_ptr.vmem [resolvable:$true] %s948_s3 }
  0x4e   : > { %620 = vmatpush.msra.mxu0 %v613_v3  ;;  %v609_v11 = vld [vmem:[#allocation5 + $0x50] sm:$0xff]  ;;  %v649_v12 = vld [vmem:[#allocation7 + $0x48] sm:$0xff]  ;;  %v648_v14 = vld [vmem:[#allocation7 + $0x40] sm:$0xff] }
  0x4f   : > { %662 = vmatpush.msra.mxu1 %v653_v4  ;;  %v608_v13 = vld [vmem:[#allocation5 + $0x48] sm:$0xff]  ;;  %v607_v15 = vld [vmem:[#allocation5 + $0x40] sm:$0xff]  ;;  %v647_v16 = vld [vmem:[#allocation7 + $0x38] sm:$0xff] }
  0x50   : > { %621 = vmatpush.msra.mxu0 %v612_v5  ;;  %v606_v17 = vld [vmem:[#allocation5 + $0x38] sm:$0xff]  ;;  %v646_v18 = vld [vmem:[#allocation7 + $0x30] sm:$0xff]  ;;  %v645_v20 = vld [vmem:[#allocation7 + $0x28] sm:$0xff] }
  0x51   : > { %663 = vmatpush.msra.mxu1 %v652_v6  ;;  %v605_v19 = vld [vmem:[#allocation5 + $0x30] sm:$0xff]  ;;  %v604_v21 = vld [vmem:[#allocation5 + $0x28] sm:$0xff]  ;;  %v644_v22 = vld [vmem:[#allocation7 + $0x20] sm:$0xff] }
  0x52   : > { %622 = vmatpush.msra.mxu0 %v611_v7  ;;  %v603_v23 = vld [vmem:[#allocation5 + $0x20] sm:$0xff]  ;;  %v643_v24 = vld [vmem:[#allocation7 + $0x18] sm:$0xff]  ;;  %v642_v26 = vld [vmem:[#allocation7 + $0x10] sm:$0xff]  ;;  %s946_s16 = scalar_lea.hbm %s1818_s14, %s1089_s26  ;;  %s1408_s28 = scalar_lea.hbm %s1818_s14, 16 }
  0x53   : > { %664 = vmatpush.msra.mxu1 %v651_v8  ;;  %v602_v25 = vld [vmem:[#allocation5 + $0x18] sm:$0xff]  ;;  %v601_v27 = vld [vmem:[#allocation5 + $0x10] sm:$0xff]  ;;  %v641_v28 = vld [vmem:[#allocation7 + $0x8] sm:$0xff] }
  0x54   : > { %623 = vmatpush.msra.mxu0 %v610_v9  ;;  %v600_v29 = vld [vmem:[#allocation5 + $0x8] sm:$0xff]  ;;  %v640_v30 = vld [vmem:[#allocation7] sm:$0xff]  ;;  %v1697_v32 = vld [vmem:[%s1678_s7] sm:$0xff]  ;;  %s1819_s7 = sld [smem:[#allocation26_spill]] }
  0x55   : > { %665 = vmatpush.msra.mxu1 %v650_v10  ;;  %v599_v31 = vld [vmem:[#allocation5] sm:$0xff]  ;;  %v1191_v33 = vld [vmem:[%s1781_s2] ss:$0 sm:$0xff]  ;;  %v740_v40 = vld [vmem:[#allocation8 + $0x78] sm:$0xff] }
  0x56   : > { %624 = vmatpush.msra.mxu0 %v609_v11  ;;  %v1192_v34 = vld [vmem:[%s1783_s4] ss:$0 sm:$0xff]  ;;  %745 = vmatpush.msra.mxu3 %v740_v40  ;;  %v738_v42 = vld [vmem:[#allocation8 + $0x68] sm:$0xff]  ;;  %v737_v43 = vld [vmem:[#allocation8 + $0x60] sm:$0xff] }
  0x57   : > { %666 = vmatpush.msra.mxu1 %v649_v12  ;;  %v739_v41 = vld [vmem:[#allocation8 + $0x70] sm:$0xff]  ;;  %v736_v44 = vld [vmem:[#allocation8 + $0x58] sm:$0xff]  ;;  %v734_v46 = vld [vmem:[#allocation8 + $0x48] sm:$0xff] }
  0x58   : > { %625 = vmatpush.msra.mxu0 %v608_v13  ;;  %746 = vmatpush.msra.mxu3 %v739_v41  ;;  %v735_v45 = vld [vmem:[#allocation8 + $0x50] sm:$0xff]  ;;  %v733_v47 = vld [vmem:[#allocation8 + $0x40] sm:$0xff]  ;;  %v732_v48 = vld [vmem:[#allocation8 + $0x38] sm:$0xff] }
  0x59   : > { %667 = vmatpush.msra.mxu1 %v648_v14  ;;  %v731_v49 = vld [vmem:[#allocation8 + $0x30] sm:$0xff]  ;;  %v730_v50 = vld [vmem:[#allocation8 + $0x28] sm:$0xff]  ;;  %v729_v51 = vld [vmem:[#allocation8 + $0x20] sm:$0xff] }
  0x5a   : > { %626 = vmatpush.msra.mxu0 %v607_v15  ;;  %747 = vmatpush.msra.mxu3 %v738_v42  ;;  %v728_v52 = vld [vmem:[#allocation8 + $0x18] sm:$0xff]  ;;  %v727_v55 = vld [vmem:[#allocation8 + $0x10] sm:$0xff]  ;;  %v726_v56 = vld [vmem:[#allocation8 + $0x8] sm:$0xff] }
  0x5b   : > { %668 = vmatpush.msra.mxu1 %v647_v16  ;;  %v725_v57 = vld [vmem:[#allocation8] sm:$0xff]  ;;  %v1193_v63 = vld [vmem:[%s1785_s6] ss:$0 sm:$0xff]  ;;  %v836_v16 = vld [vmem:[#allocation10 + $0x78] sm:$0xff] }
  0x5c   : > { %627 = vmatpush.msra.mxu0 %v606_v17  ;;  %748 = vmatpush.msra.mxu3 %v737_v43  ;;  %v835_v17 = vld [vmem:[#allocation10 + $0x70] sm:$0xff]  ;;  %v875_v41 = vld [vmem:[#allocation11 + $0x68] sm:$0xff] }
  0x5d   : > { %669 = vmatpush.msra.mxu1 %v646_v18  ;;  %v595_v18 = vlaneseq  ;;  %v876_v40 = vld [vmem:[#allocation11 + $0x70] sm:$0xff] }
  0x5e   : > { %628 = vmatpush.msra.mxu0 %v605_v19  ;;  %749 = vmatpush.msra.mxu3 %v736_v44  ;;  %v874_v44 = vld [vmem:[#allocation11 + $0x60] sm:$0xff] }
  0x5f   : > { %670 = vmatpush.msra.mxu1 %v645_v20  ;;  %v1715_v19 = vand.u32 127, %v595_v18 }
  0x60   : > { %629 = vmatpush.msra.mxu0 %v604_v21  ;;  %750 = vmatpush.msra.mxu3 %v735_v45 }
  0x61   : > { %671 = vmatpush.msra.mxu1 %v644_v22  ;;  %vm597_vm5 = vcmp.lt.s32.totalorder %v1715_v19, 32  ;;  %v1198_v19 = vld [vmem:[%s1817_s22] ss:$0 sm:$0xff] }
  0x62   : > { %630 = vmatpush.msra.mxu0 %v603_v23  ;;  %751 = vmatpush.msra.mxu3 %v734_v46  ;;  %v873_v46 = vld [vmem:[#allocation11 + $0x58] sm:$0xff] }
  0x63   : > { %672 = vmatpush.msra.mxu1 %v643_v24 }
  0x64   : > { %631 = vmatpush.msra.mxu0 %v602_v25  ;;  %752 = vmatpush.msra.mxu3 %v733_v47  ;;  %v834_v25 = vld [vmem:[#allocation10 + $0x68] sm:$0xff]  ;;  %v872_v47 = vld [vmem:[#allocation11 + $0x50] sm:$0xff] }
  0x65   : > { %673 = vmatpush.msra.mxu1 %v642_v26  ;;  %v833_v26 = vld [vmem:[#allocation10 + $0x60] sm:$0xff] }
  0x66   : > { %632 = vmatpush.msra.mxu0 %v601_v27  ;;  %753 = vmatpush.msra.mxu3 %v732_v48  ;;  %v832_v27 = vld [vmem:[#allocation10 + $0x58] sm:$0xff]  ;;  %v871_v48 = vld [vmem:[#allocation11 + $0x48] sm:$0xff] }
  0x67   : > { %674 = vmatpush.msra.mxu1 %v641_v28  ;;  %v831_v28 = vld [vmem:[#allocation10 + $0x50] sm:$0xff] }
  0x68   : > { %633 = vmatpush.msra.mxu0 %v600_v29  ;;  %754 = vmatpush.msra.mxu3 %v731_v49  ;;  %v830_v29 = vld [vmem:[#allocation10 + $0x48] sm:$0xff]  ;;  %v870_v49 = vld [vmem:[#allocation11 + $0x40] sm:$0xff] }
  0x69   : > { %675 = vmatpush.msra.mxu1 %v640_v30  ;;  %v829_v30 = vld [vmem:[#allocation10 + $0x40] sm:$0xff] }
  0x6a   : > { %634 = vmatpush.msra.mxu0 %v599_v31  ;;  %676 = vmatmul.f32.vlgmr.msra.gmra.mxu1 %v1697_v32  ;;  %v828_v31 = vld [vmem:[#allocation10 + $0x38] sm:$0xff] }
  0x6b   : > { %635 = vmatmul.f32.vlgmr.msra.gmra.mxu0 %v1697_v32  ;;  %755 = vmatpush.msra.mxu3 %v730_v50 }
  0x6d   : > { %756 = vmatpush.msra.mxu3 %v729_v51  ;;  %v869_v51 = vld [vmem:[#allocation11 + $0x38] sm:$0xff] }
  0x6f   : > { %757 = vmatpush.msra.mxu3 %v728_v52 }
  0x71   : > { %758 = vmatpush.msra.mxu3 %v727_v55  ;;  %v867_v55 = vld [vmem:[#allocation11 + $0x28] sm:$0xff] }
  0x73   : > { %759 = vmatpush.msra.mxu3 %v726_v56 }
  0x75   : > { %760 = vmatpush.msra.mxu3 %v725_v57  ;;  %v866_v57 = vld [vmem:[#allocation11 + $0x20] sm:$0xff] }
  0x76   : > { %761 = vmatmul.f32.vlgmr.msra.gmra.mxu3 %v1697_v32 }
  0xe7   : > { %v677_v35 = vpop.f32.mrf.mxu1 }
  0xe8   : > { %v636_v36 = vpop.f32.mrf.mxu0  ;;  %v678_v38 = vadd.f32 %v1192_v34, %v677_v35  ;;  %v825_v34 = vld [vmem:[#allocation10 + $0x20] sm:$0xff]  ;;  %v824_v35 = vld [vmem:[#allocation10 + $0x18] sm:$0xff] }
  0xe9   : > { %v637_v37 = vadd.f32 %v1191_v33, %v636_v36  ;;  %v826_v33 = vld [vmem:[#allocation10 + $0x28] sm:$0xff]  ;;  %v823_v36 = vld [vmem:[#allocation10 + $0x10] sm:$0xff] }
  0xea   : > { %695 = vmatpush.xpose.msra.mxu2 %v678_v38  ;;  %v821_v38 = vld [vmem:[#allocation10] sm:$0xff] }
  0xeb   : > { %v639_v39 = vmul.f32 0.17677669, %v637_v37  ;;  %v822_v37 = vld [vmem:[#allocation10 + $0x8] sm:$0xff] }
  0xed   : > { %696 = vmatmul.f32.vlgmr.msra.gmra.mxu2 %v639_v39  ;;  %v877_v39 = vld [vmem:[#allocation11 + $0x78] sm:$0xff] }
  0xee   : > { %882 = vmatpush.msrb.mxu0 %v877_v39 }
  0xf0   : > { %883 = vmatpush.msrb.mxu0 %v876_v40 }
  0xf2   : > { %884 = vmatpush.msrb.mxu0 %v875_v41 }
  0xf4   : > { %885 = vmatpush.msrb.mxu0 %v874_v44 }
  0xf6   : > { %886 = vmatpush.msrb.mxu0 %v873_v46 }
  0xf8   : > { %887 = vmatpush.msrb.mxu0 %v872_v47 }
  0xf9   : > { %v762_v0 = vpop.f32.mrf.mxu3 }
  0xfa   : > { %v763_v1 = vadd.f32 %v1193_v63, %v762_v0  ;;  %888 = vmatpush.msrb.mxu0 %v871_v48  ;;  %v1195_v0 = vld [vmem:[%s1791_s12] ss:$0 sm:$0xff] }
  0xfc   : > { %783 = vmatpush.msrb.mxu2 %v763_v1  ;;  %889 = vmatpush.msrb.mxu0 %v870_v49 }
  0xfe   : > { %841 = vmatpush.msra.mxu2 %v836_v16  ;;  %890 = vmatpush.msrb.mxu0 %v869_v51 }
 0x100   : > { %842 = vmatpush.msra.mxu2 %v835_v17 }
 0x102   : > { %843 = vmatpush.msra.mxu2 %v834_v25 }
 0x104   : > { %844 = vmatpush.msra.mxu2 %v833_v26 }
 0x106   : > { %845 = vmatpush.msra.mxu2 %v832_v27 }
 0x108   : > { %846 = vmatpush.msra.mxu2 %v831_v28 }
 0x10a   : > { %847 = vmatpush.msra.mxu2 %v830_v29 }
 0x10c   : > { %848 = vmatpush.msra.mxu2 %v829_v30 }
 0x10e   : > { %849 = vmatpush.msra.mxu2 %v828_v31  ;;  %v1199_v31 = vld [vmem:[%s1819_s7] ss:$0 sm:$0xff] }
 0x170   : > { %v697_v53 = vpop.f32.mrf.mxu2 }
 0x171   : > { %v701_v54 = vsel %vm700_vm0, %v697_v53, -inf }
 0x172   : > { %702 = vmax.xlane.f32.xlu0 %v701_v54 }
 0x1e5   : > { %v703_v58 = vpop.xlane.xlu0 %702 }
 0x1e6   : > { %v704_v59 = vsub.f32 %v697_v53, %v703_v58  ;;  %v868_v53 = vld [vmem:[#allocation11 + $0x30] sm:$0xff] }
 0x1e7   : > { %891 = vmatpush.msrb.mxu0 %v868_v53 }
 0x1e8   : > { %v705_v60 = vmul.f32 1.442695, %v704_v59  ;;  %v865_v59 = vld [vmem:[#allocation11 + $0x18] sm:$0xff] }
 0x1e9   : > { %892 = vmatpush.msrb.mxu0 %v867_v55 }
 0x1ea   : > { %1200 = vpow2.f32 %v705_v60 }
 0x1eb   : > { %893 = vmatpush.msrb.mxu0 %v866_v57 }
 0x1ed   : > { %894 = vmatpush.msrb.mxu0 %v865_v59 }
 0x1f0   : > { %v1201_v61 = vpop.eup %1200 }
 0x1f1   : > { %v707_v62 = vsel %vm700_vm0, %v1201_v61, 0.0 }
 0x1f2   : > { %708 = vadd.xlane.f32.xlu0 %v707_v62 }
 0x265   : > { %v709_v2 = vpop.xlane.xlu0 %708 }
 0x266   : > { %1202 = vrcp.f32 %v709_v2  ;;  %v721_v6 = vand.u32 2147483648, %v709_v2  ;;  %v719_v8 = vand.u32 2147483647, %v709_v2  ;;  %vm715_vm2 = vweird.f32 %v709_v2 }
 0x268   : > { %v722_v10 = vor.u32 1.1754944e-38, %v721_v6  ;;  %vm720_vm4 = vcmp.eq.f32.partialorder %v719_v8, 8.507059e+37  ;;  %v1196_v6 = vld [vmem:[%s1787_s8] ss:$0 sm:$0xff] }
 0x26c   : > { %v1203_v3 = vpop.eup %1202 }
 0x26d   : > { %v711_v4 = vmul.f32 %v1203_v3, %v709_v2  ;;  %vm716_vm1 = vweird.f32 %v1203_v3 }
 0x26e   : > { %vm717_vm3 = vmor %vm715_vm2, %vm716_vm1 }
 0x26f   : > { %v712_v5 = vsub.f32 1.0, %v711_v4  ;;  %v863_v4 = vld [vmem:[#allocation11 + $0x8] sm:$0xff] }
 0x271   : > { %v713_v7 = vmul.f32 %v1203_v3, %v712_v5  ;;  %v862_v5 = vld [vmem:[#allocation11] sm:$0xff] }
 0x273   : > { %v714_v9 = vadd.f32 %v1203_v3, %v713_v7 }
 0x275   : > { %v718_v11 = vsel %vm717_vm3, %v1203_v3, %v714_v9  ;;  %v864_v3 = vld [vmem:[#allocation11 + $0x10] sm:$0xff] }
 0x276   : > { %v723_v12 = vsel %vm720_vm4, %v722_v10, %v718_v11  ;;  %895 = vmatpush.msrb.mxu0 %v864_v3  ;;  %v1197_v10 = vld [vmem:[%s1816_s9] ss:$0 sm:$0xff]  ;;  %s950_s9 = sshll.u32 %s946_s16, 4  ;;  %s951_s9 = int_to_ptr.hbm [resolvable:$true] %s950_s9 }
 0x277   : > { %v724_v13 = vmul.f32 %v1201_v61, %v723_v12  ;;  %v1194_v61 = vld [vmem:[%s1790_s11] ss:$0 sm:$0xff]  ;;  %s1402_s23 = sshra.s32 %s951_s9, 4  ;;  %s1403_s23 = int_to_ptr.hbm [resolvable:$true] %s1402_s23 }
 0x278   : > { %896 = vmatpush.msrb.mxu0 %v863_v4  ;;  %s1404_s26 = scalar_lea.hbm %s1403_s23, 8  ;;  %p1409_p12 = scmp.lt.s32.totalorder %s1403_s23, %s1818_s14 }
 0x279   : > { %1087 = vmatmul.msk.f32.vlgmr.msrb.gmra.mxu2 %vm700_vm0, %v724_v13  ;;  %p1405_p1 = scmp.ne.s32.totalorder %s1403_s23, %s1404_s26  ;;  %p1410_p8 = scmp.lt.s32.totalorder %s1408_s28, %s1404_s26 }
 0x27a   : > { %897 = vmatpush.msrb.mxu0 %v862_v5 }
 0x27b   : > { %p1406_p3 = pnand %p1405_p1, %p1641_p13  ;;  %p1411_p7 = por %p1410_p8, %p1409_p12 }
 0x27d   : > { %p1407_p5 = pneg %p1406_p3 }
 0x27f   : > { %p1412_p9 = pnand %p1411_p7, %p1407_p5 }
 0x2fc   : > { %v785_v14 = vpop.f32.mrf.mxu2 }
 0x2fd   : > { %v786_v15 = vadd.f32 %v785_v14, %v1697_v32  ;;  %v827_v32 = vld [vmem:[#allocation10 + $0x30] sm:$0xff] }
 0x2fe   : > { %850 = vmatpush.msra.mxu2 %v827_v32 }
 0x2ff   : > { %790 = vadd.xlane.f32.xlu1 %v786_v15 }
 0x300   : > { %851 = vmatpush.msra.mxu2 %v826_v33 }
 0x302   : > { %852 = vmatpush.msra.mxu2 %v825_v34 }
 0x304   : > { %853 = vmatpush.msra.mxu2 %v824_v35 }
 0x306   : > { %854 = vmatpush.msra.mxu2 %v823_v36 }
 0x308   : > { %855 = vmatpush.msra.mxu2 %v822_v37 }
 0x30a   : > { %856 = vmatpush.msra.mxu2 %v821_v38 }
 0x372   : > { %v791_v20 = vpop.xlane.xlu1 %790 }
 0x373   : > { %v792_v21 = vmul.f32 0.03125, %v791_v20 }
 0x375   : > { %v1718_v22 = vsub.f32 %v786_v15, %v792_v21 }
 0x377   : > { %v796_v23 = vsel %vm597_vm5, %v1718_v22, 0.0 }
 0x378   : > { %v797_v24 = vmul.f32 %v796_v23, %v796_v23 }
 0x37a   : > { %798 = vadd.xlane.f32.xlu1 %v797_v24 }
 0x3ed   : > { %v799_v42 = vpop.xlane.xlu1 %798 }
 0x3ee   : > { %v800_v43 = vmul.f32 0.03125, %v799_v42 }
 0x3f0   : > { %v801_v45 = vadd.f32 1e-05, %v800_v43 }
 0x3f2   : > { %1204 = vrsqrt.f32 %v801_v45  ;;  %vm808_vm7 = vweird.f32 %v801_v45 }
 0x3f8   : > { %v1205_v50 = vpop.eup %1204 }
 0x3f9   : > { %v803_v52 = vmul.f32 %v1205_v50, %v801_v45  ;;  %vm809_vm6 = vweird.f32 %v1205_v50 }
 0x3fa   : > { %vm810_vm8 = vmor %vm808_vm7, %vm809_vm6 }
 0x3fb   : > { %v804_v54 = vmul.f32 %v1205_v50, %v803_v52 }
 0x3fd   : > { %v805_v56 = vmul.f32 0.5, %v804_v54 }
 0x3ff   : > { %v806_v58 = vsub.f32 1.5, %v805_v56 }
 0x401   : > { %v807_v60 = vmul.f32 %v1205_v50, %v806_v58 }
 0x403   : > { %v811_v62 = vsel %vm810_vm8, %v1205_v50, %v807_v60 }
 0x404   : > { %v812_v63 = vmul.f32 %v811_v62, %v1718_v22 }
 0x406   : > { %v816_v1 = vmul.f32 %v1194_v61, %v812_v63 }
 0x408   : > { %v820_v2 = vadd.f32 %v1195_v0, %v816_v1 }
 0x40a   : > { %857 = vmatmul.f32.vlgmr.msra.gmra.mxu2 %v820_v2 }
 0x48d   : > { %v858_v7 = vpop.f32.mrf.mxu2 }
 0x48e   : > { %v859_v8 = vadd.f32 %v1196_v6, %v858_v7 }
 0x490   : > { %v861_v9 = vmax.f32 %v859_v8, 0.0 }
 0x492   : > { %898 = vmatmul.f32.vlgmr.msrb.gmra.mxu0 %v861_v9 }
 0x50f   : > { %v899_v11 = vpop.f32.mrf.mxu0 }
 0x510   : > { %v900_v12 = vadd.f32 %v1197_v10, %v899_v11 }
 0x512   : > { %v902_v13 = vadd.f32 %v900_v12, %v820_v2 }
 0x514   : > { %905 = vadd.xlane.f32.xlu2 %v902_v13 }
 0x587   : > { %v906_v14 = vpop.xlane.xlu2 %905 }
 0x588   : > { %v907_v15 = vmul.f32 0.03125, %v906_v14 }
 0x58a   : > { %v908_v16 = vsub.f32 %v902_v13, %v907_v15 }
 0x58c   : > { %v909_v17 = vsel %vm597_vm5, %v908_v16, 0.0 }
 0x58d   : > { %v910_v18 = vmul.f32 %v909_v17, %v909_v17 }
 0x58f   : > { %911 = vadd.xlane.f32.xlu2 %v910_v18 }
 0x602   : > { %v912_v20 = vpop.xlane.xlu2 %911 }
 0x603   : > { %v913_v21 = vmul.f32 0.03125, %v912_v20 }
 0x605   : > { %v914_v22 = vadd.f32 1e-05, %v913_v21 }
 0x607   : > { %1206 = vrsqrt.f32 %v914_v22  ;;  %vm921_vm10 = vweird.f32 %v914_v22 }
 0x60d   : > { %v1207_v23 = vpop.eup %1206 }
 0x60e   : > { %v916_v24 = vmul.f32 %v1207_v23, %v914_v22  ;;  %vm922_vm9 = vweird.f32 %v1207_v23 }
 0x60f   : > { %vm923_vm11 = vmor %vm921_vm10, %vm922_vm9 }
 0x610   : > { %v917_v25 = vmul.f32 %v1207_v23, %v916_v24 }
 0x612   : > { %v918_v26 = vmul.f32 0.5, %v917_v25 }
 0x614   : > { %v919_v27 = vsub.f32 1.5, %v918_v26 }
 0x616   : > { %v920_v28 = vmul.f32 %v1207_v23, %v919_v27 }
 0x618   : > { %v924_v29 = vsel %vm923_vm11, %v1207_v23, %v920_v28 }
 0x619   : > { %v925_v30 = vmul.f32 %v924_v29, %v908_v16 }
 0x61b   : > { %v929_v32 = vmul.f32 %v1198_v19, %v925_v30 }
 0x61d   : > { %v933_v33 = vadd.f32 %v1199_v31, %v929_v32 }
 0x61f   : > { %934 = vst [vmem:[%s594_s25] sm:$0xff] %v933_v33 }
 0x620   : > { %1415 = shalt.err (!%p1412_p9)
}
 0x621   : > { %1114 = dma.vmem_to_hbm [thread:$0]  (%p1641_p13), %s949_s3, 128, %s951_s9, %s936_s17  }
 0x622 PF: > { %s962_s15 = sand.u32 1, %s1454_s18   ;;  %p1820_p10 = scmp.ge.s32.totalorder %s1466_s21, 2 }
 0x623   : > { %s963_s16 = scalar_lea.sflag [#allocation4], %s962_s15 }
 0x624   : > { %p1137_p11 = pnand %p1820_p10, %p1646_p4 }
 0x626   : > { %p1138_p0 = pneg %p1137_p11 }
 0x628   : > { %1449 = dma.done.wait (%p1138_p0), %s963_s16, 128  }
 0x629   : > { %1451 = vsyncadd (%p1138_p0), %s963_s16, 4294967168  ;;  %p31_p2 = scmp.ge.s32.totalorder %s1621_s29, 4   ;;  %s1821_s18 = smov %s1458_s19 }
 0x62a   : > { %s1822_s19 = smov %s1462_s20  ;;  %s1823_s20 = smov %s1633_s5 }
 0x62b   : > { %s1824_s21 = smov %s1621_s29  ;;  %33 = sbr.rel (!%p31_p2) target bundleno = 18 (0x12), region = 145 }
 0x630   :  { %969 = vsyncpa [#allocation3], 1 }
 0x631   :  { %971 = vsyncpa [#allocation3 + $0x1], 1 }
 0x632   :  { %972 = vsyncpa [#allocation6], 1 }
 0x633   :  { %973 = vsyncpa [#allocation9], 1 }
 0x634   :  { %974 = vsyncpa [#allocation12], 1 }
 0x635   :  { %975 = vsyncpa [#allocation4], 1 }
 0x636   :  { %977 = vsyncpa [#allocation4 + $0x1], 1 }

</bundles_post_ra>
